<compile_context>
chip_gen: v7x
topology: tpu7x:2x2x1
jax: 0.10.0
libtpu: 0.0.40
codegen_flags: <defaults>
</compile_context>

<pallas_src>
import functools

import jax
import jax.numpy as jnp
import numpy as np
from jax.experimental import pallas as pl
from jax.experimental.pallas import tpu as pltpu


def _bottleneck_kernel(x_ref, xp_ref, xn_ref,
                       w1_ref, w2_ref, w3_ref,
                       s1_ref, b1_ref, s2_ref, b2_ref, s3_ref, b3_ref,
                       o_ref, h1p_ref, *, compute_dtype):
    f32 = jnp.float32
    cdt = compute_dtype
    _, td, hh, ww, cin = x_ref.shape
    c1 = w1_ref.shape[-1]
    c3 = w3_ref.shape[-1]
    m = td * hh * ww

    t = pl.program_id(1)
    nt = pl.num_programs(1)

    x = x_ref[0]                        # (td, hh, ww, cin), input dtype (f32)
    xc = x.astype(cdt)

    # -------- conv1: (3,1,1) temporal conv as 3 whole-slab matmuls (K=cin) ---
    acc1 = jnp.dot(xc.reshape(m, cin), w1_ref[1],
                   preferred_element_type=f32)                     # center tap

    prev_ok = jnp.where(t > 0, 1.0, 0.0).astype(cdt)    # zero-pad at global d=0
    prev = xp_ref[0, 0].astype(cdt) * prev_ok           # (hh, ww, cin)
    if td > 1:
        left_src = jnp.concatenate([prev[None], xc[:td - 1]], axis=0)
    else:
        left_src = prev[None]
    acc1 = acc1 + jnp.dot(left_src.reshape(m, cin), w1_ref[0],
                          preferred_element_type=f32)

    next_ok = jnp.where(t < nt - 1, 1.0, 0.0).astype(cdt)   # zero-pad at d=D-1
    nxt = xn_ref[0, 0].astype(cdt) * next_ok
    if td > 1:
        right_src = jnp.concatenate([xc[1:], nxt[None]], axis=0)
    else:
        right_src = nxt[None]
    acc1 = acc1 + jnp.dot(right_src.reshape(m, cin), w1_ref[2],
                          preferred_element_type=f32)

    # folded eval-mode BN1 + ReLU (f32 epilogue on the accumulator)
    h1 = jnp.maximum(acc1 * s1_ref[...] + b1_ref[...], 0.0)        # (m, c1)

    # -------- stage h1 once per step into a zero-haloed VMEM scratch --------
    h1p_ref[...] = jnp.zeros((td, hh + 2, ww + 2, c1), f32)
    h1p_ref[:, 1:hh + 1, 1:ww + 1, :] = h1.reshape(td, hh, ww, c1)

    # -------- conv2: (1,3,3) spatial conv, 9 whole-slab taps, f32 acc -------
    acc2 = jnp.zeros((m, c1), f32)
    for kh in range(3):
        for kw in range(3):
            tap = h1p_ref[:, kh:kh + hh, kw:kw + ww, :].astype(cdt)
            acc2 = acc2 + jnp.dot(tap.reshape(m, c1), w2_ref[kh, kw],
                                  preferred_element_type=f32)

    h2 = jnp.maximum(acc2 * s2_ref[...] + b2_ref[...], 0.0)        # (m, c1)

    # -------- conv3: 1x1x1 expansion + BN3 + residual + ReLU ----------------
    y = jnp.dot(h2.astype(cdt), w3_ref[...], preferred_element_type=f32)
    y = y * s3_ref[...] + b3_ref[...]
    y = y + x.reshape(m, cin).astype(f32)   # identity path (downsample=None)
    y = jnp.maximum(y, 0.0)
    o_ref[0] = y.reshape(td, hh, ww, c3).astype(o_ref.dtype)


def bottleneck3d(x, params, *, tile_d=None, compute_dtype=jnp.bfloat16):
    """Bottleneck3d forward (eval-mode, default config).  x: (N, D, H, W, Cin)."""
    n, d, hh, ww, cin = x.shape
    w1, w2, w3 = params["w1"], params["w2"], params["w3"]
    assert w1.shape[0] == 3 and w2.shape[:2] == (3, 3)
    c1 = w1.shape[-1]
    c3 = w3.shape[-1]
    assert cin == c3, "downsample=None requires in_planes == planes * expansion"

    if tile_d is None:
        tile_d = 1
        for cand in (4, 2, 1):
            if d % cand == 0:
                tile_d = cand
                break
    td = tile_d
    assert d % td == 0, "depth must be divisible by tile_d"
    nt = d // td

    f32 = jnp.float32
    cdt = compute_dtype
    w1c, w2c, w3c = (w.astype(cdt) for w in (w1, w2, w3))
    vec = lambda v: jnp.asarray(v, f32).reshape(1, -1)

    kernel = functools.partial(_bottleneck_kernel, compute_dtype=cdt)

    x_map = lambda i, j: (i, j, 0, 0, 0)
    # Temporal halo slices: clamped at the ends, contribution masked in-kernel.
    prev_map = lambda i, j: (i, jnp.maximum(j * td - 1, 0), 0, 0, 0)
    next_map = lambda i, j: (i, jnp.minimum(j * td + td, d - 1), 0, 0, 0)
    w3_map = lambda i, j: (0, 0, 0)
    w4_map = lambda i, j: (0, 0, 0, 0)
    v_map = lambda i, j: (0, 0)

    grid_spec = pltpu.PrefetchScalarGridSpec(
        num_scalar_prefetch=0,
        grid=(n, nt),
        in_specs=[
            pl.BlockSpec((1, td, hh, ww, cin), x_map),   # current D tile
            pl.BlockSpec((1, 1, hh, ww, cin), prev_map), # slice d0 - 1
            pl.BlockSpec((1, 1, hh, ww, cin), next_map), # slice d0 + td
            pl.BlockSpec((3, cin, c1), w3_map),          # conv1 weights (bf16)
            pl.BlockSpec((3, 3, c1, c1), w4_map),        # conv2 weights (bf16)
            pl.BlockSpec((c1, c3), v_map),               # conv3 weights (bf16)
            pl.BlockSpec((1, c1), v_map),                # bn1 scale
            pl.BlockSpec((1, c1), v_map),                # bn1 bias
            pl.BlockSpec((1, c1), v_map),                # bn2 scale
            pl.BlockSpec((1, c1), v_map),                # bn2 bias
            pl.BlockSpec((1, c3), v_map),                # bn3 scale
            pl.BlockSpec((1, c3), v_map),                # bn3 bias
        ],
        out_specs=pl.BlockSpec((1, td, hh, ww, c3), x_map),
        scratch_shapes=[pltpu.VMEM((td, hh + 2, ww + 2, c1), f32)],
    )

    return pl.pallas_call(
        kernel,
        out_shape=jax.ShapeDtypeStruct((n, d, hh, ww, c3), x.dtype),
        grid_spec=grid_spec,
        compiler_params=pltpu.CompilerParams(
            dimension_semantics=("parallel", "parallel"),
            vmem_limit_bytes=48 * 1024 * 1024,
        ),
    )(x, x, x, w1c, w2c, w3c,
      vec(params["scale1"]), vec(params["bias1"]),
      vec(params["scale2"]), vec(params["bias2"]),
      vec(params["scale3"]), vec(params["bias3"]))


def _fold_bn(gamma, beta, mean, var, eps=1e-5):
    scale = gamma / jnp.sqrt(var + eps)
    return scale, beta - mean * scale


def _reference_forward(x, params, compute_dtype=jnp.bfloat16):
    """Pure-JAX reference (lax conv) with the same bf16-compute / f32-acc policy."""
    f32 = jnp.float32
    cdt = compute_dtype
    dn = ("NDHWC", "DHWIO", "NDHWC")
    cin = x.shape[-1]
    c1 = params["w1"].shape[-1]
    c3 = params["w3"].shape[-1]
    w1 = params["w1"].astype(cdt).reshape(3, 1, 1, cin, c1)
    w2 = params["w2"].astype(cdt).reshape(1, 3, 3, c1, c1)
    w3 = params["w3"].astype(cdt).reshape(1, 1, 1, c1, c3)

    h = jax.lax.conv_general_dilated(
        x.astype(cdt), w1, (1, 1, 1), [(1, 1), (0, 0), (0, 0)],
        dimension_numbers=dn, preferred_element_type=f32)
    h = jnp.maximum(h * params["scale1"] + params["bias1"], 0.0)

    h = jax.lax.conv_general_dilated(
        h.astype(cdt), w2, (1, 1, 1), [(0, 0), (1, 1), (1, 1)],
        dimension_numbers=dn, preferred_element_type=f32)
    h = jnp.maximum(h * params["scale2"] + params["bias2"], 0.0)

    o = jax.lax.conv_general_dilated(
        h.astype(cdt), w3, (1, 1, 1), [(0, 0), (0, 0), (0, 0)],
        dimension_numbers=dn, preferred_element_type=f32)
    o = o * params["scale3"] + params["bias3"] + x.astype(f32)
    return jnp.maximum(o, 0.0)


if __name__ == "__main__":
    # Small but lane-friendly config: planes=32, expansion=4 -> in/out channels
    # = 128 (lane-dense HBM loads/stores), residual valid with downsample=None.
    planes = 32
    expansion = 4
    in_planes = planes * expansion
    n, d, hh, ww = 2, 4, 8, 8

    key = jax.random.PRNGKey(0)
    ks = jax.random.split(key, 8)

    # NDHWC input (== PyTorch NCDHW (2, 128, 4, 8, 8) transposed).
    x = jax.random.normal(ks[0], (n, d, hh, ww, in_planes), jnp.float32)

    w1 = jax.random.normal(ks[1], (3, in_planes, planes), jnp.float32) * (3 * in_planes) ** -0.5
    w2 = jax.random.normal(ks[2], (3, 3, planes, planes), jnp.float32) * (9 * planes) ** -0.5
    w3 = jax.random.normal(ks[3], (planes, in_planes), jnp.float32) * planes ** -0.5

    def make_bn(k0, c):
        kg, kb, km, kv = jax.random.split(k0, 4)
        gamma = 1.0 + 0.1 * jax.random.normal(kg, (c,), jnp.float32)
        beta = 0.1 * jax.random.normal(kb, (c,), jnp.float32)
        mean = 0.1 * jax.random.normal(km, (c,), jnp.float32)
        var = jax.random.uniform(kv, (c,), jnp.float32, minval=0.5, maxval=1.5)
        return _fold_bn(gamma, beta, mean, var)

    s1, b1 = make_bn(ks[4], planes)
    s2, b2 = make_bn(ks[5], planes)
    s3, b3 = make_bn(ks[6], in_planes)

    params = {"w1": w1, "w2": w2, "w3": w3,
              "scale1": s1, "bias1": b1,
              "scale2": s2, "bias2": b2,
              "scale3": s3, "bias3": b3}

    out = jax.block_until_ready(bottleneck3d(x, params, tile_d=2))
    ref = jax.block_until_ready(_reference_forward(x, params))

    assert out.shape == (n, d, hh, ww, in_planes)
    np.testing.assert_allclose(np.asarray(out), np.asarray(ref),
                               rtol=1e-2, atol=1e-2)
    print("KERNEL_OK")
</pallas_src>

<mosaic_0001>
module attributes {stable_mosaic.version = 11 : i64} {
  func.func @_bottleneck_kernel(%arg0: i32, %arg1: i32, %arg2: memref<1x2x8x8x128xf32, #tpu.memory_space<vmem>>, %arg3: memref<1x1x8x8x128xf32, #tpu.memory_space<vmem>>, %arg4: memref<1x1x8x8x128xf32, #tpu.memory_space<vmem>>, %arg5: memref<3x128x32xbf16, #tpu.memory_space<vmem>>, %arg6: memref<3x3x32x32xbf16, #tpu.memory_space<vmem>>, %arg7: memref<32x128xbf16, #tpu.memory_space<vmem>>, %arg8: memref<1x32xf32, #tpu.memory_space<vmem>>, %arg9: memref<1x32xf32, #tpu.memory_space<vmem>>, %arg10: memref<1x32xf32, #tpu.memory_space<vmem>>, %arg11: memref<1x32xf32, #tpu.memory_space<vmem>>, %arg12: memref<1x128xf32, #tpu.memory_space<vmem>>, %arg13: memref<1x128xf32, #tpu.memory_space<vmem>>, %arg14: memref<1x2x8x8x128xf32, #tpu.memory_space<vmem>>, %arg15: memref<2x10x10x32xf32, #tpu.memory_space<vmem>>) attributes {dimension_semantics = [#tpu.dimension_semantics<parallel>, #tpu.dimension_semantics<parallel>], iteration_bounds = array<i64: 2, 2>, scalar_prefetch = 0 : i64, scratch_operands = 1 : i64, tpu.core_type = #tpu.core_type<tc>, window_params = [{transform_indices = @transform_0, window_bounds = array<i64: 1, 2, 8, 8, 128>}, {transform_indices = @transform_1, window_bounds = array<i64: 1, 1, 8, 8, 128>}, {transform_indices = @transform_2, window_bounds = array<i64: 1, 1, 8, 8, 128>}, {pipeline_mode = #tpu.pipeline_mode<synchronous>, transform_indices = @transform_3, window_bounds = array<i64: 3, 128, 32>}, {pipeline_mode = #tpu.pipeline_mode<synchronous>, transform_indices = @transform_4, window_bounds = array<i64: 3, 3, 32, 32>}, {pipeline_mode = #tpu.pipeline_mode<synchronous>, transform_indices = @transform_5, window_bounds = array<i64: 32, 128>}, {pipeline_mode = #tpu.pipeline_mode<synchronous>, transform_indices = @transform_6, window_bounds = array<i64: 1, 32>}, {pipeline_mode = #tpu.pipeline_mode<synchronous>, transform_indices = @transform_7, window_bounds = array<i64: 1, 32>}, {pipeline_mode = #tpu.pipeline_mode<synchronous>, transform_indices = @transform_8, window_bounds = array<i64: 1, 32>}, {pipeline_mode = #tpu.pipeline_mode<synchronous>, transform_indices = @transform_9, window_bounds = array<i64: 1, 32>}, {pipeline_mode = #tpu.pipeline_mode<synchronous>, transform_indices = @transform_10, window_bounds = array<i64: 1, 128>}, {pipeline_mode = #tpu.pipeline_mode<synchronous>, transform_indices = @transform_11, window_bounds = array<i64: 1, 128>}, {transform_indices = @transform_12, window_bounds = array<i64: 1, 2, 8, 8, 128>}]} {
    %c0 = arith.constant 0 : index
    %c0_0 = arith.constant 0 : index
    %c0_1 = arith.constant 0 : index
    %c0_2 = arith.constant 0 : index
    %c0_3 = arith.constant 0 : index
    %0 = vector.load %arg2[%c0, %c0_0, %c0_1, %c0_2, %c0_3] : memref<1x2x8x8x128xf32, #tpu.memory_space<vmem>>, vector<1x2x8x8x128xf32>
    %1 = vector.shape_cast %0 : vector<1x2x8x8x128xf32> to vector<2x8x8x128xf32>
    %2 = arith.truncf %1 : vector<2x8x8x128xf32> to vector<2x8x8x128xbf16>
    %3 = vector.shape_cast %2 : vector<2x8x8x128xbf16> to vector<128x128xbf16>
    %c1 = arith.constant 1 : index
    %c0_4 = arith.constant 0 : index
    %c0_5 = arith.constant 0 : index
    %4 = vector.load %arg5[%c1, %c0_4, %c0_5] : memref<3x128x32xbf16, #tpu.memory_space<vmem>>, vector<1x128x32xbf16>
    %5 = vector.shape_cast %4 : vector<1x128x32xbf16> to vector<128x32xbf16>
    %cst = arith.constant dense<0.000000e+00> : vector<128x32xf32>
    %6 = tpu.matmul %3, %5, %cst {dimension_numbers = #tpu.dot_dimension_numbers<[1], [0], [0], [1], [0, 0, 1, 1], [], []>} : vector<128x128xbf16>, vector<128x32xbf16>, vector<128x32xf32> -> vector<128x32xf32>
    %c0_i32 = arith.constant 0 : i32
    %7 = arith.cmpi sgt, %arg1, %c0_i32 : i32
    %cst_6 = arith.constant 1.000000e+00 : f32
    %cst_7 = arith.constant 0.000000e+00 : f32
    %8 = arith.select %7, %cst_6, %cst_7 : f32
    %9 = arith.truncf %8 : f32 to bf16
    %c0_8 = arith.constant 0 : index
    %c0_9 = arith.constant 0 : index
    %c0_10 = arith.constant 0 : index
    %c0_11 = arith.constant 0 : index
    %c0_12 = arith.constant 0 : index
    %10 = vector.load %arg3[%c0_8, %c0_9, %c0_10, %c0_11, %c0_12] : memref<1x1x8x8x128xf32, #tpu.memory_space<vmem>>, vector<1x1x8x8x128xf32>
    %11 = vector.shape_cast %10 : vector<1x1x8x8x128xf32> to vector<8x8x128xf32>
    %12 = arith.truncf %11 : vector<8x8x128xf32> to vector<8x8x128xbf16>
    %13 = vector.broadcast %9 : bf16 to vector<8x8x128xbf16>
    %14 = arith.mulf %12, %13 : vector<8x8x128xbf16>
    %15 = vector.shape_cast %14 : vector<8x8x128xbf16> to vector<1x8x8x128xbf16>
    %16 = vector.extract_strided_slice %2 {offsets = [0, 0, 0, 0], sizes = [1, 8, 8, 128], strides = [1, 1, 1, 1]} : vector<2x8x8x128xbf16> to vector<1x8x8x128xbf16>
    %17 = tpu.concatenate %15, %16 in 0 : vector<1x8x8x128xbf16>, vector<1x8x8x128xbf16> -> vector<2x8x8x128xbf16>
    %18 = vector.shape_cast %17 : vector<2x8x8x128xbf16> to vector<128x128xbf16>
    %c0_13 = arith.constant 0 : index
    %c0_14 = arith.constant 0 : index
    %c0_15 = arith.constant 0 : index
    %19 = vector.load %arg5[%c0_13, %c0_14, %c0_15] : memref<3x128x32xbf16, #tpu.memory_space<vmem>>, vector<1x128x32xbf16>
    %20 = vector.shape_cast %19 : vector<1x128x32xbf16> to vector<128x32xbf16>
    %cst_16 = arith.constant dense<0.000000e+00> : vector<128x32xf32>
    %21 = tpu.matmul %18, %20, %cst_16 {dimension_numbers = #tpu.dot_dimension_numbers<[1], [0], [0], [1], [0, 0, 1, 1], [], []>} : vector<128x128xbf16>, vector<128x32xbf16>, vector<128x32xf32> -> vector<128x32xf32>
    %22 = arith.addf %6, %21 : vector<128x32xf32>
    %c1_i32 = arith.constant 1 : i32
    %23 = arith.cmpi slt, %arg1, %c1_i32 : i32
    %cst_17 = arith.constant 1.000000e+00 : f32
    %cst_18 = arith.constant 0.000000e+00 : f32
    %24 = arith.select %23, %cst_17, %cst_18 : f32
    %25 = arith.truncf %24 : f32 to bf16
    %c0_19 = arith.constant 0 : index
    %c0_20 = arith.constant 0 : index
    %c0_21 = arith.constant 0 : index
    %c0_22 = arith.constant 0 : index
    %c0_23 = arith.constant 0 : index
    %26 = vector.load %arg4[%c0_19, %c0_20, %c0_21, %c0_22, %c0_23] : memref<1x1x8x8x128xf32, #tpu.memory_space<vmem>>, vector<1x1x8x8x128xf32>
    %27 = vector.shape_cast %26 : vector<1x1x8x8x128xf32> to vector<8x8x128xf32>
    %28 = arith.truncf %27 : vector<8x8x128xf32> to vector<8x8x128xbf16>
    %29 = vector.broadcast %25 : bf16 to vector<8x8x128xbf16>
    %30 = arith.mulf %28, %29 : vector<8x8x128xbf16>
    %31 = vector.extract_strided_slice %2 {offsets = [1, 0, 0, 0], sizes = [1, 8, 8, 128], strides = [1, 1, 1, 1]} : vector<2x8x8x128xbf16> to vector<1x8x8x128xbf16>
    %32 = vector.shape_cast %30 : vector<8x8x128xbf16> to vector<1x8x8x128xbf16>
    %33 = tpu.concatenate %31, %32 in 0 : vector<1x8x8x128xbf16>, vector<1x8x8x128xbf16> -> vector<2x8x8x128xbf16>
    %34 = vector.shape_cast %33 : vector<2x8x8x128xbf16> to vector<128x128xbf16>
    %c2 = arith.constant 2 : index
    %c0_24 = arith.constant 0 : index
    %c0_25 = arith.constant 0 : index
    %35 = vector.load %arg5[%c2, %c0_24, %c0_25] : memref<3x128x32xbf16, #tpu.memory_space<vmem>>, vector<1x128x32xbf16>
    %36 = vector.shape_cast %35 : vector<1x128x32xbf16> to vector<128x32xbf16>
    %cst_26 = arith.constant dense<0.000000e+00> : vector<128x32xf32>
    %37 = tpu.matmul %34, %36, %cst_26 {dimension_numbers = #tpu.dot_dimension_numbers<[1], [0], [0], [1], [0, 0, 1, 1], [], []>} : vector<128x128xbf16>, vector<128x32xbf16>, vector<128x32xf32> -> vector<128x32xf32>
    %38 = arith.addf %22, %37 : vector<128x32xf32>
    %c0_27 = arith.constant 0 : index
    %c0_28 = arith.constant 0 : index
    %39 = vector.load %arg8[%c0_27, %c0_28] : memref<1x32xf32, #tpu.memory_space<vmem>>, vector<1x32xf32>
    %40 = vector.broadcast %39 : vector<1x32xf32> to vector<128x32xf32>
    %41 = arith.mulf %38, %40 : vector<128x32xf32>
    %c0_29 = arith.constant 0 : index
    %c0_30 = arith.constant 0 : index
    %42 = vector.load %arg9[%c0_29, %c0_30] : memref<1x32xf32, #tpu.memory_space<vmem>>, vector<1x32xf32>
    %43 = vector.broadcast %42 : vector<1x32xf32> to vector<128x32xf32>
    %44 = arith.addf %41, %43 : vector<128x32xf32>
    %cst_31 = arith.constant 0.000000e+00 : f32
    %45 = vector.broadcast %cst_31 : f32 to vector<128x32xf32>
    %46 = arith.maximumf %44, %45 : vector<128x32xf32>
    %cst_32 = arith.constant 0.000000e+00 : f32
    %47 = vector.broadcast %cst_32 : f32 to vector<2x10x10x32xf32>
    %c0_33 = arith.constant 0 : index
    %c0_34 = arith.constant 0 : index
    %c0_35 = arith.constant 0 : index
    %c0_36 = arith.constant 0 : index
    %48 = vector.load %arg15[%c0_33, %c0_34, %c0_35, %c0_36] : memref<2x10x10x32xf32, #tpu.memory_space<vmem>>, vector<2x10x10x32xf32>
    tpu.vector_store %arg15[%c0_33, %c0_34, %c0_35, %c0_36], %47 {strides = array<i32>} : memref<2x10x10x32xf32, #tpu.memory_space<vmem>>, vector<2x10x10x32xf32>,
    %49 = vector.shape_cast %46 : vector<128x32xf32> to vector<2x8x8x32xf32>
    %c0_37 = arith.constant 0 : index
    %c1_38 = arith.constant 1 : index
    %c1_39 = arith.constant 1 : index
    %c0_40 = arith.constant 0 : index
    %50 = vector.load %arg15[%c0_37, %c1_38, %c1_39, %c0_40] : memref<2x10x10x32xf32, #tpu.memory_space<vmem>>, vector<2x8x8x32xf32>
    tpu.vector_store %arg15[%c0_37, %c1_38, %c1_39, %c0_40], %49 {strides = array<i32>} : memref<2x10x10x32xf32, #tpu.memory_space<vmem>>, vector<2x8x8x32xf32>,
    %cst_41 = arith.constant 0.000000e+00 : f32
    %51 = vector.broadcast %cst_41 : f32 to vector<128x32xf32>
    %c0_42 = arith.constant 0 : index
    %c0_43 = arith.constant 0 : index
    %c0_44 = arith.constant 0 : index
    %c0_45 = arith.constant 0 : index
    %52 = vector.load %arg15[%c0_42, %c0_43, %c0_44, %c0_45] : memref<2x10x10x32xf32, #tpu.memory_space<vmem>>, vector<2x8x8x32xf32>
    %53 = arith.truncf %52 : vector<2x8x8x32xf32> to vector<2x8x8x32xbf16>
    %54 = vector.shape_cast %53 : vector<2x8x8x32xbf16> to vector<128x32xbf16>
    %c0_46 = arith.constant 0 : index
    %c0_47 = arith.constant 0 : index
    %c0_48 = arith.constant 0 : index
    %c0_49 = arith.constant 0 : index
    %55 = vector.load %arg6[%c0_46, %c0_47, %c0_48, %c0_49] : memref<3x3x32x32xbf16, #tpu.memory_space<vmem>>, vector<1x1x32x32xbf16>
    %56 = vector.shape_cast %55 : vector<1x1x32x32xbf16> to vector<32x32xbf16>
    %cst_50 = arith.constant dense<0.000000e+00> : vector<128x32xf32>
    %57 = tpu.matmul %54, %56, %cst_50 {dimension_numbers = #tpu.dot_dimension_numbers<[1], [0], [0], [1], [0, 0, 1, 1], [], []>} : vector<128x32xbf16>, vector<32x32xbf16>, vector<128x32xf32> -> vector<128x32xf32>
    %58 = arith.addf %51, %57 : vector<128x32xf32>
    %c0_51 = arith.constant 0 : index
    %c0_52 = arith.constant 0 : index
    %c1_53 = arith.constant 1 : index
    %c0_54 = arith.constant 0 : index
    %59 = vector.load %arg15[%c0_51, %c0_52, %c1_53, %c0_54] : memref<2x10x10x32xf32, #tpu.memory_space<vmem>>, vector<2x8x8x32xf32>
    %60 = arith.truncf %59 : vector<2x8x8x32xf32> to vector<2x8x8x32xbf16>
    %61 = vector.shape_cast %60 : vector<2x8x8x32xbf16> to vector<128x32xbf16>
    %c0_55 = arith.constant 0 : index
    %c1_56 = arith.constant 1 : index
    %c0_57 = arith.constant 0 : index
    %c0_58 = arith.constant 0 : index
    %62 = vector.load %arg6[%c0_55, %c1_56, %c0_57, %c0_58] : memref<3x3x32x32xbf16, #tpu.memory_space<vmem>>, vector<1x1x32x32xbf16>
    %63 = vector.shape_cast %62 : vector<1x1x32x32xbf16> to vector<32x32xbf16>
    %cst_59 = arith.constant dense<0.000000e+00> : vector<128x32xf32>
    %64 = tpu.matmul %61, %63, %cst_59 {dimension_numbers = #tpu.dot_dimension_numbers<[1], [0], [0], [1], [0, 0, 1, 1], [], []>} : vector<128x32xbf16>, vector<32x32xbf16>, vector<128x32xf32> -> vector<128x32xf32>
    %65 = arith.addf %58, %64 : vector<128x32xf32>
    %c0_60 = arith.constant 0 : index
    %c0_61 = arith.constant 0 : index
    %c2_62 = arith.constant 2 : index
    %c0_63 = arith.constant 0 : index
    %66 = vector.load %arg15[%c0_60, %c0_61, %c2_62, %c0_63] : memref<2x10x10x32xf32, #tpu.memory_space<vmem>>, vector<2x8x8x32xf32>
    %67 = arith.truncf %66 : vector<2x8x8x32xf32> to vector<2x8x8x32xbf16>
    %68 = vector.shape_cast %67 : vector<2x8x8x32xbf16> to vector<128x32xbf16>
    %c0_64 = arith.constant 0 : index
    %c2_65 = arith.constant 2 : index
    %c0_66 = arith.constant 0 : index
    %c0_67 = arith.constant 0 : index
    %69 = vector.load %arg6[%c0_64, %c2_65, %c0_66, %c0_67] : memref<3x3x32x32xbf16, #tpu.memory_space<vmem>>, vector<1x1x32x32xbf16>
    %70 = vector.shape_cast %69 : vector<1x1x32x32xbf16> to vector<32x32xbf16>
    %cst_68 = arith.constant dense<0.000000e+00> : vector<128x32xf32>
    %71 = tpu.matmul %68, %70, %cst_68 {dimension_numbers = #tpu.dot_dimension_numbers<[1], [0], [0], [1], [0, 0, 1, 1], [], []>} : vector<128x32xbf16>, vector<32x32xbf16>, vector<128x32xf32> -> vector<128x32xf32>
    %72 = arith.addf %65, %71 : vector<128x32xf32>
    %c0_69 = arith.constant 0 : index
    %c1_70 = arith.constant 1 : index
    %c0_71 = arith.constant 0 : index
    %c0_72 = arith.constant 0 : index
    %73 = vector.load %arg15[%c0_69, %c1_70, %c0_71, %c0_72] : memref<2x10x10x32xf32, #tpu.memory_space<vmem>>, vector<2x8x8x32xf32>
    %74 = arith.truncf %73 : vector<2x8x8x32xf32> to vector<2x8x8x32xbf16>
    %75 = vector.shape_cast %74 : vector<2x8x8x32xbf16> to vector<128x32xbf16>
    %c1_73 = arith.constant 1 : index
    %c0_74 = arith.constant 0 : index
    %c0_75 = arith.constant 0 : index
    %c0_76 = arith.constant 0 : index
    %76 = vector.load %arg6[%c1_73, %c0_74, %c0_75, %c0_76] : memref<3x3x32x32xbf16, #tpu.memory_space<vmem>>, vector<1x1x32x32xbf16>
    %77 = vector.shape_cast %76 : vector<1x1x32x32xbf16> to vector<32x32xbf16>
    %cst_77 = arith.constant dense<0.000000e+00> : vector<128x32xf32>
    %78 = tpu.matmul %75, %77, %cst_77 {dimension_numbers = #tpu.dot_dimension_numbers<[1], [0], [0], [1], [0, 0, 1, 1], [], []>} : vector<128x32xbf16>, vector<32x32xbf16>, vector<128x32xf32> -> vector<128x32xf32>
    %79 = arith.addf %72, %78 : vector<128x32xf32>
    %c0_78 = arith.constant 0 : index
    %c1_79 = arith.constant 1 : index
    %c1_80 = arith.constant 1 : index
    %c0_81 = arith.constant 0 : index
    %80 = vector.load %arg15[%c0_78, %c1_79, %c1_80, %c0_81] : memref<2x10x10x32xf32, #tpu.memory_space<vmem>>, vector<2x8x8x32xf32>
    %81 = arith.truncf %80 : vector<2x8x8x32xf32> to vector<2x8x8x32xbf16>
    %82 = vector.shape_cast %81 : vector<2x8x8x32xbf16> to vector<128x32xbf16>
    %c1_82 = arith.constant 1 : index
    %c1_83 = arith.constant 1 : index
    %c0_84 = arith.constant 0 : index
    %c0_85 = arith.constant 0 : index
    %83 = vector.load %arg6[%c1_82, %c1_83, %c0_84, %c0_85] : memref<3x3x32x32xbf16, #tpu.memory_space<vmem>>, vector<1x1x32x32xbf16>
    %84 = vector.shape_cast %83 : vector<1x1x32x32xbf16> to vector<32x32xbf16>
    %cst_86 = arith.constant dense<0.000000e+00> : vector<128x32xf32>
    %85 = tpu.matmul %82, %84, %cst_86 {dimension_numbers = #tpu.dot_dimension_numbers<[1], [0], [0], [1], [0, 0, 1, 1], [], []>} : vector<128x32xbf16>, vector<32x32xbf16>, vector<128x32xf32> -> vector<128x32xf32>
    %86 = arith.addf %79, %85 : vector<128x32xf32>
    %c0_87 = arith.constant 0 : index
    %c1_88 = arith.constant 1 : index
    %c2_89 = arith.constant 2 : index
    %c0_90 = arith.constant 0 : index
    %87 = vector.load %arg15[%c0_87, %c1_88, %c2_89, %c0_90] : memref<2x10x10x32xf32, #tpu.memory_space<vmem>>, vector<2x8x8x32xf32>
    %88 = arith.truncf %87 : vector<2x8x8x32xf32> to vector<2x8x8x32xbf16>
    %89 = vector.shape_cast %88 : vector<2x8x8x32xbf16> to vector<128x32xbf16>
    %c1_91 = arith.constant 1 : index
    %c2_92 = arith.constant 2 : index
    %c0_93 = arith.constant 0 : index
    %c0_94 = arith.constant 0 : index
    %90 = vector.load %arg6[%c1_91, %c2_92, %c0_93, %c0_94] : memref<3x3x32x32xbf16, #tpu.memory_space<vmem>>, vector<1x1x32x32xbf16>
    %91 = vector.shape_cast %90 : vector<1x1x32x32xbf16> to vector<32x32xbf16>
    %cst_95 = arith.constant dense<0.000000e+00> : vector<128x32xf32>
    %92 = tpu.matmul %89, %91, %cst_95 {dimension_numbers = #tpu.dot_dimension_numbers<[1], [0], [0], [1], [0, 0, 1, 1], [], []>} : vector<128x32xbf16>, vector<32x32xbf16>, vector<128x32xf32> -> vector<128x32xf32>
    %93 = arith.addf %86, %92 : vector<128x32xf32>
    %c0_96 = arith.constant 0 : index
    %c2_97 = arith.constant 2 : index
    %c0_98 = arith.constant 0 : index
    %c0_99 = arith.constant 0 : index
    %94 = vector.load %arg15[%c0_96, %c2_97, %c0_98, %c0_99] : memref<2x10x10x32xf32, #tpu.memory_space<vmem>>, vector<2x8x8x32xf32>
    %95 = arith.truncf %94 : vector<2x8x8x32xf32> to vector<2x8x8x32xbf16>
    %96 = vector.shape_cast %95 : vector<2x8x8x32xbf16> to vector<128x32xbf16>
    %c2_100 = arith.constant 2 : index
    %c0_101 = arith.constant 0 : index
    %c0_102 = arith.constant 0 : index
    %c0_103 = arith.constant 0 : index
    %97 = vector.load %arg6[%c2_100, %c0_101, %c0_102, %c0_103] : memref<3x3x32x32xbf16, #tpu.memory_space<vmem>>, vector<1x1x32x32xbf16>
    %98 = vector.shape_cast %97 : vector<1x1x32x32xbf16> to vector<32x32xbf16>
    %cst_104 = arith.constant dense<0.000000e+00> : vector<128x32xf32>
    %99 = tpu.matmul %96, %98, %cst_104 {dimension_numbers = #tpu.dot_dimension_numbers<[1], [0], [0], [1], [0, 0, 1, 1], [], []>} : vector<128x32xbf16>, vector<32x32xbf16>, vector<128x32xf32> -> vector<128x32xf32>
    %100 = arith.addf %93, %99 : vector<128x32xf32>
    %c0_105 = arith.constant 0 : index
    %c2_106 = arith.constant 2 : index
    %c1_107 = arith.constant 1 : index
    %c0_108 = arith.constant 0 : index
    %101 = vector.load %arg15[%c0_105, %c2_106, %c1_107, %c0_108] : memref<2x10x10x32xf32, #tpu.memory_space<vmem>>, vector<2x8x8x32xf32>
    %102 = arith.truncf %101 : vector<2x8x8x32xf32> to vector<2x8x8x32xbf16>
    %103 = vector.shape_cast %102 : vector<2x8x8x32xbf16> to vector<128x32xbf16>
    %c2_109 = arith.constant 2 : index
    %c1_110 = arith.constant 1 : index
    %c0_111 = arith.constant 0 : index
    %c0_112 = arith.constant 0 : index
    %104 = vector.load %arg6[%c2_109, %c1_110, %c0_111, %c0_112] : memref<3x3x32x32xbf16, #tpu.memory_space<vmem>>, vector<1x1x32x32xbf16>
    %105 = vector.shape_cast %104 : vector<1x1x32x32xbf16> to vector<32x32xbf16>
    %cst_113 = arith.constant dense<0.000000e+00> : vector<128x32xf32>
    %106 = tpu.matmul %103, %105, %cst_113 {dimension_numbers = #tpu.dot_dimension_numbers<[1], [0], [0], [1], [0, 0, 1, 1], [], []>} : vector<128x32xbf16>, vector<32x32xbf16>, vector<128x32xf32> -> vector<128x32xf32>
    %107 = arith.addf %100, %106 : vector<128x32xf32>
    %c0_114 = arith.constant 0 : index
    %c2_115 = arith.constant 2 : index
    %c2_116 = arith.constant 2 : index
    %c0_117 = arith.constant 0 : index
    %108 = vector.load %arg15[%c0_114, %c2_115, %c2_116, %c0_117] : memref<2x10x10x32xf32, #tpu.memory_space<vmem>>, vector<2x8x8x32xf32>
    %109 = arith.truncf %108 : vector<2x8x8x32xf32> to vector<2x8x8x32xbf16>
    %110 = vector.shape_cast %109 : vector<2x8x8x32xbf16> to vector<128x32xbf16>
    %c2_118 = arith.constant 2 : index
    %c2_119 = arith.constant 2 : index
    %c0_120 = arith.constant 0 : index
    %c0_121 = arith.constant 0 : index
    %111 = vector.load %arg6[%c2_118, %c2_119, %c0_120, %c0_121] : memref<3x3x32x32xbf16, #tpu.memory_space<vmem>>, vector<1x1x32x32xbf16>
    %112 = vector.shape_cast %111 : vector<1x1x32x32xbf16> to vector<32x32xbf16>
    %cst_122 = arith.constant dense<0.000000e+00> : vector<128x32xf32>
    %113 = tpu.matmul %110, %112, %cst_122 {dimension_numbers = #tpu.dot_dimension_numbers<[1], [0], [0], [1], [0, 0, 1, 1], [], []>} : vector<128x32xbf16>, vector<32x32xbf16>, vector<128x32xf32> -> vector<128x32xf32>
    %114 = arith.addf %107, %113 : vector<128x32xf32>
    %c0_123 = arith.constant 0 : index
    %c0_124 = arith.constant 0 : index
    %115 = vector.load %arg10[%c0_123, %c0_124] : memref<1x32xf32, #tpu.memory_space<vmem>>, vector<1x32xf32>
    %116 = vector.broadcast %115 : vector<1x32xf32> to vector<128x32xf32>
    %117 = arith.mulf %114, %116 : vector<128x32xf32>
    %c0_125 = arith.constant 0 : index
    %c0_126 = arith.constant 0 : index
    %118 = vector.load %arg11[%c0_125, %c0_126] : memref<1x32xf32, #tpu.memory_space<vmem>>, vector<1x32xf32>
    %119 = vector.broadcast %118 : vector<1x32xf32> to vector<128x32xf32>
    %120 = arith.addf %117, %119 : vector<128x32xf32>
    %cst_127 = arith.constant 0.000000e+00 : f32
    %121 = vector.broadcast %cst_127 : f32 to vector<128x32xf32>
    %122 = arith.maximumf %120, %121 : vector<128x32xf32>
    %123 = arith.truncf %122 : vector<128x32xf32> to vector<128x32xbf16>
    %c0_128 = arith.constant 0 : index
    %c0_129 = arith.constant 0 : index
    %124 = vector.load %arg7[%c0_128, %c0_129] : memref<32x128xbf16, #tpu.memory_space<vmem>>, vector<32x128xbf16>
    %cst_130 = arith.constant dense<0.000000e+00> : vector<128x128xf32>
    %125 = tpu.matmul %123, %124, %cst_130 {dimension_numbers = #tpu.dot_dimension_numbers<[1], [0], [0], [1], [0, 0, 1, 1], [], []>} : vector<128x32xbf16>, vector<32x128xbf16>, vector<128x128xf32> -> vector<128x128xf32>
    %c0_131 = arith.constant 0 : index
    %c0_132 = arith.constant 0 : index
    %126 = vector.load %arg12[%c0_131, %c0_132] : memref<1x128xf32, #tpu.memory_space<vmem>>, vector<1x128xf32>
    %127 = vector.broadcast %126 : vector<1x128xf32> to vector<128x128xf32>
    %128 = arith.mulf %125, %127 : vector<128x128xf32>
    %c0_133 = arith.constant 0 : index
    %c0_134 = arith.constant 0 : index
    %129 = vector.load %arg13[%c0_133, %c0_134] : memref<1x128xf32, #tpu.memory_space<vmem>>, vector<1x128xf32>
    %130 = vector.broadcast %129 : vector<1x128xf32> to vector<128x128xf32>
    %131 = arith.addf %128, %130 : vector<128x128xf32>
    %132 = vector.shape_cast %1 : vector<2x8x8x128xf32> to vector<128x128xf32>
    %133 = arith.addf %131, %132 : vector<128x128xf32>
    %cst_135 = arith.constant 0.000000e+00 : f32
    %134 = vector.broadcast %cst_135 : f32 to vector<128x128xf32>
    %135 = arith.maximumf %133, %134 : vector<128x128xf32>
    %136 = vector.shape_cast %135 : vector<128x128xf32> to vector<2x8x8x128xf32>
    %c0_136 = arith.constant 0 : index
    %c0_137 = arith.constant 0 : index
    %c0_138 = arith.constant 0 : index
    %c0_139 = arith.constant 0 : index
    %c0_140 = arith.constant 0 : index
    %137 = vector.load %arg14[%c0_136, %c0_137, %c0_138, %c0_139, %c0_140] : memref<1x2x8x8x128xf32, #tpu.memory_space<vmem>>, vector<1x2x8x8x128xf32>
    %138 = vector.shape_cast %137 : vector<1x2x8x8x128xf32> to vector<2x8x8x128xf32>
    %139 = vector.shape_cast %136 : vector<2x8x8x128xf32> to vector<1x2x8x8x128xf32>
    tpu.vector_store %arg14[%c0_136, %c0_137, %c0_138, %c0_139, %c0_140], %139 {strides = array<i32>} : memref<1x2x8x8x128xf32, #tpu.memory_space<vmem>>, vector<1x2x8x8x128xf32>,
    return
  }
  func.func @transform_0(%arg0: i32, %arg1: i32) -> (i32, i32, i32, i32, i32) {
    %c0_i32 = arith.constant 0 : i32
    %c0_i32_0 = arith.constant 0 : i32
    %c0_i32_1 = arith.constant 0 : i32
    %c0_i32_2 = arith.constant 0 : i32
    return %arg0, %arg1, %c0_i32, %c0_i32_0, %c0_i32_1 : i32, i32, i32, i32, i32
  }
  func.func @transform_1(%arg0: i32, %arg1: i32) -> (i32, i32, i32, i32, i32) {
    %c2_i32 = arith.constant 2 : i32
    %0 = arith.muli %arg1, %c2_i32 : i32
    %c1_i32 = arith.constant 1 : i32
    %1 = arith.subi %0, %c1_i32 : i32
    %c0_i32 = arith.constant 0 : i32
    %2 = arith.maxsi %1, %c0_i32 : i32
    %c0_i32_0 = arith.constant 0 : i32
    %c0_i32_1 = arith.constant 0 : i32
    %c0_i32_2 = arith.constant 0 : i32
    %c0_i32_3 = arith.constant 0 : i32
    return %arg0, %2, %c0_i32_0, %c0_i32_1, %c0_i32_2 : i32, i32, i32, i32, i32
  }
  func.func @transform_2(%arg0: i32, %arg1: i32) -> (i32, i32, i32, i32, i32) {
    %c2_i32 = arith.constant 2 : i32
    %0 = arith.muli %arg1, %c2_i32 : i32
    %c2_i32_0 = arith.constant 2 : i32
    %1 = arith.addi %0, %c2_i32_0 : i32
    %c3_i32 = arith.constant 3 : i32
    %2 = arith.minsi %1, %c3_i32 : i32
    %c0_i32 = arith.constant 0 : i32
    %c0_i32_1 = arith.constant 0 : i32
    %c0_i32_2 = arith.constant 0 : i32
    %c0_i32_3 = arith.constant 0 : i32
    return %arg0, %2, %c0_i32, %c0_i32_1, %c0_i32_2 : i32, i32, i32, i32, i32
  }
  func.func @transform_3(%arg0: i32, %arg1: i32) -> (i32, i32, i32) {
    %c0_i32 = arith.constant 0 : i32
    %c0_i32_0 = arith.constant 0 : i32
    %c0_i32_1 = arith.constant 0 : i32
    %c0_i32_2 = arith.constant 0 : i32
    return %c0_i32, %c0_i32_0, %c0_i32_1 : i32, i32, i32
  }
  func.func @transform_4(%arg0: i32, %arg1: i32) -> (i32, i32, i32, i32) {
    %c0_i32 = arith.constant 0 : i32
    %c0_i32_0 = arith.constant 0 : i32
    %c0_i32_1 = arith.constant 0 : i32
    %c0_i32_2 = arith.constant 0 : i32
    %c0_i32_3 = arith.constant 0 : i32
    return %c0_i32, %c0_i32_0, %c0_i32_1, %c0_i32_2 : i32, i32, i32, i32
  }
  func.func @transform_5(%arg0: i32, %arg1: i32) -> (i32, i32) {
    %c0_i32 = arith.constant 0 : i32
    %c0_i32_0 = arith.constant 0 : i32
    %c0_i32_1 = arith.constant 0 : i32
    return %c0_i32, %c0_i32_0 : i32, i32
  }
  func.func @transform_6(%arg0: i32, %arg1: i32) -> (i32, i32) {
    %c0_i32 = arith.constant 0 : i32
    %c0_i32_0 = arith.constant 0 : i32
    %c0_i32_1 = arith.constant 0 : i32
    return %c0_i32, %c0_i32_0 : i32, i32
  }
  func.func @transform_7(%arg0: i32, %arg1: i32) -> (i32, i32) {
    %c0_i32 = arith.constant 0 : i32
    %c0_i32_0 = arith.constant 0 : i32
    %c0_i32_1 = arith.constant 0 : i32
    return %c0_i32, %c0_i32_0 : i32, i32
  }
  func.func @transform_8(%arg0: i32, %arg1: i32) -> (i32, i32) {
    %c0_i32 = arith.constant 0 : i32
    %c0_i32_0 = arith.constant 0 : i32
    %c0_i32_1 = arith.constant 0 : i32
    return %c0_i32, %c0_i32_0 : i32, i32
  }
  func.func @transform_9(%arg0: i32, %arg1: i32) -> (i32, i32) {
    %c0_i32 = arith.constant 0 : i32
    %c0_i32_0 = arith.constant 0 : i32
    %c0_i32_1 = arith.constant 0 : i32
    return %c0_i32, %c0_i32_0 : i32, i32
  }
  func.func @transform_10(%arg0: i32, %arg1: i32) -> (i32, i32) {
    %c0_i32 = arith.constant 0 : i32
    %c0_i32_0 = arith.constant 0 : i32
    %c0_i32_1 = arith.constant 0 : i32
    return %c0_i32, %c0_i32_0 : i32, i32
  }
  func.func @transform_11(%arg0: i32, %arg1: i32) -> (i32, i32) {
    %c0_i32 = arith.constant 0 : i32
    %c0_i32_0 = arith.constant 0 : i32
    %c0_i32_1 = arith.constant 0 : i32
    return %c0_i32, %c0_i32_0 : i32, i32
  }
  func.func @transform_12(%arg0: i32, %arg1: i32) -> (i32, i32, i32, i32, i32) {
    %c0_i32 = arith.constant 0 : i32
    %c0_i32_0 = arith.constant 0 : i32
    %c0_i32_1 = arith.constant 0 : i32
    %c0_i32_2 = arith.constant 0 : i32
    return %arg0, %arg1, %c0_i32, %c0_i32_0, %c0_i32_1 : i32, i32, i32, i32, i32
  }
}

</mosaic_0001>

<bundles_post_ra>
// kernel: tpu_custom_call.1
= control target key start
LH: loop header
LB: loop body
LE: loop exit
PB: predicated region body
PF: predicated region fallthrough
CT: control target
= control target key end

     0   :  { %s6549_s0 = inlined_call_operand.hbm [shape: f32[2,4,8,8,128], index: 0, kind: input, shape index: {}]   ;;  %s6550_s1 = inlined_call_operand.hbm [shape: f32[2,4,8,8,128], index: 1, kind: input, shape index: {}]   ;;  %s6551_s2 = inlined_call_operand.hbm [shape: f32[2,4,8,8,128], index: 2, kind: input, shape index: {}]   ;;  %s6552_s3 = inlined_call_operand.vmem [shape: bf16[3,128,32], index: 3, kind: input, shape index: {}]   ;;  %s6553_s4 = inlined_call_operand.vmem [shape: bf16[3,3,32,32], index: 4, kind: input, shape index: {}]   ;;  %s6554_s5 = inlined_call_operand.vmem [shape: bf16[32,128], index: 5, kind: input, shape index: {}]   ;;  %s6555_s6 = inlined_call_operand.vmem [shape: f32[1,32], index: 6, kind: input, shape index: {}]   ;;  %s6556_s7 = inlined_call_operand.vmem [shape: f32[1,32], index: 7, kind: input, shape index: {}]   ;;  %s6557_s8 = inlined_call_operand.vmem [shape: f32[1,32], index: 8, kind: input, shape index: {}]   ;;  %s6558_s9 = inlined_call_operand.vmem [shape: f32[1,32], index: 9, kind: input, shape index: {}]   ;;  %s6559_s10 = inlined_call_operand.vmem [shape: f32[1,128], index: 10, kind: input, shape index: {}]   ;;  %s6560_s11 = inlined_call_operand.vmem [shape: f32[1,128], index: 11, kind: input, shape index: {}]   ;;  %s6561_s12 = inlined_call_operand.hbm [shape: f32[2,4,8,8,128], index: 12, kind: output, shape index: {}]  }
   0x1   :  { %6588 = sst [smem:[#allocation26_spill]] %s6549_s0 }
   0x2   :  { %6589 = sst [smem:[#allocation27_spill]] %s6550_s1 }
   0x3   :  { %6590 = sst [smem:[#allocation28_spill]] %s6551_s2 }
   0x4   :  { %6591 = sst [smem:[#allocation29_spill]] %s6552_s3 }
   0x5   :  { %6592 = sst [smem:[#allocation30_spill]] %s6553_s4 }
   0x6   :  { %6593 = sst [smem:[#allocation31_spill]] %s6554_s5 }
   0x7   :  { %6594 = sst [smem:[#allocation32_spill]] %s6555_s6 }
   0x8   :  { %6595 = sst [smem:[#allocation33_spill]] %s6556_s7 }
   0x9   :  { %6596 = sst [smem:[#allocation34_spill]] %s6557_s8 }
   0xa   :  { %6597 = sst [smem:[#allocation35_spill]] %s6558_s9 }
   0xb   :  { %6598 = sst [smem:[#allocation36_spill]] %s6559_s10 }
   0xc   :  { %6599 = sst [smem:[#allocation37_spill]] %s6560_s11 }
   0xd   :  { %6600 = sst [smem:[#allocation38_spill]] %s6561_s12 }
   0xe   :  { %17 = vsyncpa [#allocation4], 0 }
   0xf   :  { %19 = vsyncpa [#allocation4 + $0x1], 0 }
  0x10   :  { %20 = vsyncpa [#allocation7], 0 }
  0x11   :  { %22 = vsyncpa [#allocation7 + $0x1], 0 }
  0x12   :  { %23 = vsyncpa [#allocation5], 0 }
  0x13   :  { %25 = vsyncpa [#allocation5 + $0x1], 0  ;;  %s5387_s21 = smov 0   ;;  %s5389_s22 = smov 0  }
  0x14   :  { %s5391_s23 = smov 0   ;;  %s5393_s24 = smov 0  }
  0x15   :  { %s5395_s25 = smov 0   ;;  %s5397_s26 = smov 0  }
  0x16   :  { %s5399_s27 = smov 0   ;;  %s5401_s28 = smov 0  }
  0x17   :  { %s5403_s29 = smov 0   ;;  %s5405_s30 = smov 0  }
  0x18   :  { %s5407_s13 = smov 0   ;;  %s5409_s14 = smov 0  }
  0x19   :  { %s5411_s15 = smov 0   ;;  %s5413_s16 = smov 0  }
  0x1a LB: > { %6601 = sst [smem:[#allocation14_spill]] %s5275_s25  ;;  %s5458_s17 = sadd.s32 4294967295, %s5311_s16   ;;  %s5311_s16 = sphi %s5413_s16, %s31_s16   ;;  %s5307_s15 = sphi %s5411_s15, %s6671_s15   ;;  %s5303_s14 = sphi %s5409_s14, %s6670_s14   ;;  %s5299_s13 = sphi %s5407_s13, %s6669_s13   ;;  %s5295_s30 = sphi %s5405_s30, %s6668_s30   ;;  %s5291_s29 = sphi %s5403_s29, %s6667_s29   ;;  %s5287_s28 = sphi %s5401_s28, %s6678_s28   ;;  %s5283_s27 = sphi %s5399_s27, %s6677_s27   ;;  %s5279_s26 = sphi %s5397_s26, %s6676_s26   ;;  %s5275_s25 = sphi %s5395_s25, %s6675_s25   ;;  %s5271_s24 = sphi %s5393_s24, %s6664_s24   ;;  %s5267_s23 = sphi %s5391_s23, %s6674_s23   ;;  %s5263_s22 = sphi %s5389_s22, %s6673_s22   ;;  %s5259_s21 = sphi %s5387_s21, %s6672_s21  }
  0x1b   : > { %6602 = sst [smem:[#allocation15_spill]] %s5291_s29  ;;  %s40_s18 = sadd.s32 1, %s5303_s14 }
  0x1c   : > { %6603 = sst [smem:[#allocation16_spill]] %s5295_s30  ;;  %p41_p0 = scmp.ge.s32.totalorder %s40_s18, 2 }
  0x1d   : > { %6604 = sst [smem:[#allocation17_spill]] %s5299_s13  ;;  %s43_s19 = sadd.s32 1, %s5307_s15 }
  0x1e   : > { %6605 = sst [smem:[#allocation18_spill]] %s5303_s14  ;;  %p6576_p1 = scmp.eq.s32.totalorder %s5311_s16, 0 }
  0x1f   : > { %6606 = sst [smem:[#allocation19_spill]] %s5307_s15  ;;  %p6575_p2 = scmp.eq.s32.totalorder %s5458_s17, 0 }
  0x20   : > { %s6680_s18 = smov (%p41_p0, %s40_s18), 0  ;;  %s6682_s19 = smov (!%p41_p0, %s43_s19), %s5307_s15 }
  0x21   : > { %6607 = sst [smem:[#allocation20_spill]] %s6680_s18  ;;  %s48_s20 = ssub.s32 %s5303_s14, %s6680_s18 }
  0x22   : > { %s3862_s12 = sshll.u32 %s5303_s14, 1  ;;  %p45_p3 = scmp.ge.s32.totalorder %s6682_s19, 2 }
  0x23   : > { %s3863_s13 = sadd.s32 4294967295, %s3862_s12  ;;  %s3864_s11 = sshll.u32 %s6680_s18, 1 }
  0x24   : > { %p77_p4 = scmp.gt.s32.totalorder %s3863_s13, 0  ;;  %s6684_s19 = smov (%p45_p3, %s6682_s19), 0 }
  0x25   : > { %6608 = sst [smem:[#allocation21_spill]] %s6684_s19  ;;  %s5475_s10 = ssub.s32 %s5307_s15, %s6684_s19 }
  0x26   : > { %s6686_s13 = smov (!%p77_p4, %s3863_s13), 0  ;;  %6609 = sst [smem:[#allocation22_spill]] %s5475_s10 }
  0x27   : > { %s3865_s9 = sadd.s32 4294967295, %s3864_s11  ;;  %s5478_s8 = sor.u32 %s48_s20, %s5475_s10 }
  0x28   : > { %p81_p5 = scmp.gt.s32.totalorder %s3865_s9, 0  ;;  %s88_s5 = sadd.s32 1, %s5279_s26 }
  0x29   : > { %p95_p7 = scmp.ne.s32.totalorder %s5279_s26, %s5275_s25  ;;  %p101_p8 = scmp.ne.s32.totalorder %s5275_s25, %s5271_s24 }
  0x2a   : > { %s6688_s9 = smov (!%p81_p5, %s3865_s9), 0  ;;  %s5486_s19 = sadd.s32 2, %s3862_s12 }
  0x2b   : > { %s84_s18 = ssub.s32 %s6686_s13, %s6688_s9  ;;  %p5491_p9 = por %p95_p7, %p6576_p1 }
  0x2c   : > { %s85_s7 = sor.u32 %s84_s18, %s5475_s10  ;;  %p5497_p11 = por %p101_p8, %p6575_p2 }
  0x2d   : > { %p86_p10 = scmp.eq.s32.totalorder %s85_s7, 0  ;;  %s5502_s24 = sadd.s32 2, %s3864_s11 }
  0x2e   : > { %s6611_s6 = scalar_select %p5497_p11, 1, 0 }
  0x2f   : > { %s5505_s9 = scalar_select %p86_p10, %s5279_s26, %s88_s5  }
  0x30   : > { %6612 = sst [smem:[#allocation23_spill]] %s6611_s6  ;;  %p6574_p0 = scmp.lt.s32.totalorder %s5311_s16, 4 }
  0x31   : > { %6613 = sst [smem:[#allocation24_spill]] %s5505_s9  ;;  %s5510_s12 = sshll.u32 %s5307_s15, 5 }
  0x32   : > { %s429_s7 = sand.u32 1, %s5311_s16   ;;  %s431_s18 = sand.u32 1, %s5279_s26  }
  0x33   : > { %s3875_s4 = sshll.u32 %s431_s18, 6  ;;  %s3878_s3 = sshll.u32 %s6686_s13, 3 }
  0x34   : > { %s443_s30 = sadd.s32 %s3878_s3, %s5510_s12  ;;  %s433_s6 = scalar_lea.vmem [#allocation6], %s3875_s4 }
  0x35   : > { %s446_s25 = sshll.u32 %s433_s6, 4  ;;  %s3880_s2 = sshll.u32 %s443_s30, 7  ;;  %s5515_s25 = int_to_ptr.vmem [resolvable:$true] %s446_s25 }
  0x36   : > { %s6614_s1 = sld [smem:[#allocation27_spill]]  ;;  %p5526_p3 = pnand %p6574_p0, %p5491_p9 }
  0x37   : > { %s5532_s3 = scalar_lea.sflag [#allocation7], %s429_s7 }
  0x38   : > { %p5069_p8 = pneg %p5526_p3 }
  0x3c   : > { %s5520_s5 = scalar_lea.hbm %s6614_s1, %s3880_s2  ;;  %s5072_s10 = scalar_lea.hbm %s6614_s1, 8192 }
  0x3d   : > { %s5067_s4 = scalar_lea.hbm %s5520_s5, 1024  ;;  %p5073_p9 = scmp.lt.u32.totalorder %s5520_s5, %s6614_s1 }
  0x3e   : > { %p5068_p7 = scmp.ne.s32.totalorder %s5520_s5, %s5067_s4  ;;  %p5074_p12 = scmp.lt.u32.totalorder %s5072_s10, %s5067_s4 }
  0x3f   : > { %p5076_p2 = scmp.lt.u32.totalorder %s5067_s4, %s5520_s5 }
  0x40   : > { %p5070_p10 = pnand %p5069_p8, %p5068_p7  ;;  %p5075_p0 = por %p5074_p12, %p5073_p9 }
  0x42   : > { %p5071_p13 = pneg %p5070_p10  ;;  %p5077_p1 = por %p5076_p2, %p5075_p0 }
  0x44   : > { %p5078_p6 = pnand %p5077_p1, %p5071_p13 }
  0x46   : > { %5081 = shalt.err (!%p5078_p6)
}
  0x47   : > { %s5082_s20 = scalar_lea.vmem %s5515_s25, 1024  ;;  %s5313_s7 = smov [#allocation6]  }
  0x48   : > { %p5083_p7 = scmp.ne.s32.totalorder %s5515_s25, %s5082_s20  ;;  %s5087_s11 = sshll.u32 %s5313_s7, 4  ;;  %s5088_s11 = int_to_ptr.vmem [resolvable:$false] %s5087_s11 }
  0x49   : > { %s5089_s2 = scalar_lea.vmem %s5088_s11, 2048  ;;  %p5090_p5 = scmp.lt.s32.totalorder %s5515_s25, %s5088_s11 }
  0x4a   : > { %p5085_p10 = pnand %p5083_p7, %p5069_p8  ;;  %p5091_p12 = scmp.lt.s32.totalorder %s5089_s2, %s5082_s20 }
  0x4c   : > { %p5086_p4 = pneg %p5085_p10  ;;  %p5092_p9 = por %p5091_p12, %p5090_p5 }
  0x4e   : > { %p5093_p2 = pnand %p5092_p9, %p5086_p4 }
  0x50   : > { %5096 = shalt.err (!%p5093_p2)
}
  0x51   : > { %s6577_s4 = smov 128   ;;  %s6579_s6 = smov 8  }
  0x52   : > { %4880 = dma.hbm_to_vmem [thread:$0]  (!%p5526_p3), %s5520_s5, 1024, %s5515_s25, %s5532_s3, %s6577_s4, %s6577_s4, %s6579_s6  }
  0x53   : > { %p6616_p1 = scmp.lt.s32.totalorder %s5311_s16, 5  ;;  %p6617_p6 = scmp.ge.s32.totalorder %s5311_s16, 1 }
  0x54   : > { %s3861_s30 = sadd.s32 4294967294, %s5311_s16   ;;  %s52_s13 = sadd.s32 1, %s5291_s29 }
  0x55   : > { %p5567_p13 = pnand %p6617_p6, %p6616_p1  ;;  %p6619_p0 = scmp.eq.s32.totalorder %s5478_s8, 0 }
  0x56   : > { %p59_p4 = scmp.ne.s32.totalorder %s5291_s29, %s5287_s28  ;;  %p65_p5 = scmp.ne.s32.totalorder %s5287_s28, %s5283_s27 }
  0x57   : > { %s5576_s20 = scalar_select %p6619_p0, %s5291_s29, %s52_s13  }
  0x58   : > { %p352_p8 = scmp.eq.s32.totalorder %s5458_s17, 3  ;;  %p358_p7 = scmp.eq.s32.totalorder %s3861_s30, 3 }
  0x59   : > { %6620 = sst [smem:[#allocation25_spill]] %s5576_s20  ;;  %p6621_p10 = scmp.eq.s32.totalorder %s5311_s16, 0 }
  0x5a   : > { %p6623_p3 = scmp.eq.s32.totalorder %s5458_s17, 0  ;;  %p5595_p2 = por %p352_p8, %p59_p4 }
  0x5b   : > { %p5585_p12 = por %p6621_p10, %p59_p4  ;;  %p5599_p1 = por %p358_p7, %p65_p5 }
  0x5c   : > { %p5591_p9 = por %p6623_p3, %p65_p5  ;;  %s405_s7 = sand.u32 1, %s5291_s29  }
  0x5d   : > { %s6625_s8 = scalar_select %p5595_p2, 1, 0 }
  0x5e   : > { %s6624_s5 = scalar_select %p5591_p9, 1, 0 }
  0x5f   : > { %s6626_s18 = scalar_select %p5599_p1, 1, 0 }
  0x60   : > { %s4180_s11 = sshll.u32 %s5303_s14, 4  ;;  %s3870_s2 = sshll.u32 %s405_s7, 7 }
  0x61   : > { %s416_s30 = sadd.s32 %s4180_s11, %s5510_s12  ;;  %s409_s4 = scalar_lea.vmem [#allocation3], %s3870_s2 }
  0x62   : > { %s3874_s13 = sshll.u32 %s416_s30, 7  ;;  %s419_s6 = sshll.u32 %s409_s4, 4  ;;  %s5611_s6 = int_to_ptr.vmem [resolvable:$true] %s419_s6 }
  0x63   : > { %s6627_s0 = sld [smem:[#allocation26_spill]]  ;;  %p6628_p6 = scmp.lt.s32.totalorder %s5311_s16, 4 }
  0x64   : > { %s5621_s4 = scalar_lea.sflag [#allocation4], %s405_s7 }
  0x65   : > { %p5617_p0 = pnand %p6628_p6, %p5585_p12 }
  0x67   : > { %p5099_p5 = pneg %p5617_p0 }
  0x69   : > { %s5609_s20 = scalar_lea.hbm %s6627_s0, %s3874_s13  ;;  %s5102_s25 = scalar_lea.hbm %s6627_s0, 8192 }
  0x6a   : > { %s5097_s11 = scalar_lea.hbm %s5609_s20, 2048  ;;  %p5103_p10 = scmp.lt.u32.totalorder %s5609_s20, %s6627_s0 }
  0x6b   : > { %p5098_p4 = scmp.ne.s32.totalorder %s5609_s20, %s5097_s11  ;;  %p5104_p12 = scmp.lt.u32.totalorder %s5102_s25, %s5097_s11 }
  0x6c   : > { %p5106_p6 = scmp.lt.u32.totalorder %s5097_s11, %s5609_s20 }
  0x6d   : > { %p5100_p8 = pnand %p5099_p5, %p5098_p4  ;;  %p5105_p3 = por %p5104_p12, %p5103_p10 }
  0x6f   : > { %p5101_p7 = pneg %p5100_p8  ;;  %p5107_p1 = por %p5106_p6, %p5105_p3 }
  0x71   : > { %p5108_p2 = pnand %p5107_p1, %p5101_p7 }
  0x73   : > { %5111 = shalt.err (!%p5108_p2)
}
  0x74   : > { %s5112_s7 = scalar_lea.vmem %s5611_s6, 2048  ;;  %s5316_s13 = smov [#allocation3]  }
  0x75   : > { %p5113_p4 = scmp.ne.s32.totalorder %s5611_s6, %s5112_s7  ;;  %s5117_s1 = sshll.u32 %s5316_s13, 4  ;;  %s5118_s1 = int_to_ptr.vmem [resolvable:$false] %s5117_s1 }
  0x76   : > { %s5119_s15 = scalar_lea.vmem %s5118_s1, 4096  ;;  %p5120_p9 = scmp.lt.s32.totalorder %s5611_s6, %s5118_s1 }
  0x77   : > { %p5115_p8 = pnand %p5113_p4, %p5099_p5  ;;  %p5121_p10 = scmp.lt.s32.totalorder %s5119_s15, %s5112_s7 }
  0x79   : > { %p5116_p11 = pneg %p5115_p8  ;;  %p5122_p12 = por %p5121_p10, %p5120_p9 }
  0x7b   : > { %p5123_p3 = pnand %p5122_p12, %p5116_p11 }
  0x7d   : > { %5126 = shalt.err (!%p5123_p3)
}
  0x7e   : > { %s6630_s11 = smov 8   ;;  %s6631_s25 = smov 128  }
  0x7f   : > { %s6632_s2 = sld [smem:[#allocation22_spill]]  ;;  %p6633_p11 = scmp.lt.s32.totalorder %s5486_s19, 3 }
  0x80   : > { %4877 = dma.hbm_to_vmem [thread:$0]  (!%p5617_p0), %s5609_s20, 2048, %s5611_s6, %s5621_s4, %s6631_s25, %s6631_s25, %s6630_s11  }
  0x81   : > { %s6690_s19 = smov (!%p6633_p11, %s5486_s19), 3  ;;  %p6634_p9 = scmp.lt.s32.totalorder %s5502_s24, 3 }
  0x82   : > { %s124_s14 = sadd.s32 1, %s5267_s23  ;;  %p131_p2 = scmp.ne.s32.totalorder %s5267_s23, %s5263_s22 }
  0x83   : > { %s6692_s24 = smov (!%p6634_p9, %s5502_s24), 3  ;;  %p137_p1 = scmp.ne.s32.totalorder %s5263_s22, %s5259_s21 }
  0x84   : > { %s120_s30 = ssub.s32 %s6690_s19, %s6692_s24  ;;  %p6635_p5 = scmp.eq.s32.totalorder %s5311_s16, 0 }
  0x85   : > { %s121_s7 = sor.u32 %s120_s30, %s6632_s2  ;;  %p6637_p4 = scmp.eq.s32.totalorder %s5458_s17, 0 }
  0x86   : > { %p5666_p7 = por %p131_p2, %p6635_p5  ;;  %p122_p6 = scmp.eq.s32.totalorder %s121_s7, 0 }
  0x87   : > { %p5672_p8 = por %p137_p1, %p6637_p4  ;;  %s458_s20 = sand.u32 1, %s5267_s23  }
  0x88   : > { %s3883_s4 = sshll.u32 %s6690_s19, 3  ;;  %s3881_s24 = sshll.u32 %s458_s20, 6 }
  0x89   : > { %s6638_s6 = scalar_select %p5672_p8, 1, 0 }
  0x8a   : > { %s5678_s1 = scalar_select %p122_p6, %s5267_s23, %s124_s14  }
  0x8b   : > { %s470_s15 = sadd.s32 %s3883_s4, %s5510_s12  ;;  %s6639_s0 = sld [smem:[#allocation28_spill]] }
  0x8c   : > { %s3885_s21 = sshll.u32 %s470_s15, 7  ;;  %s460_s7 = scalar_lea.vmem [#allocation8], %s3881_s24 }
  0x8d   : > { %s473_s9 = sshll.u32 %s460_s7, 4  ;;  %p6640_p0 = scmp.lt.s32.totalorder %s5311_s16, 4  ;;  %s5686_s9 = int_to_ptr.vmem [resolvable:$true] %s473_s9 }
  0x8f   : > { %p5692_p10 = pnand %p6640_p0, %p5666_p7 }
  0x91   : > { %s5684_s29 = scalar_lea.hbm %s6639_s0, %s3885_s21  ;;  %p5129_p3 = pneg %p5692_p10 }
  0x92   : > { %s5127_s12 = scalar_lea.hbm %s5684_s29, 1024  ;;  %s5132_s4 = scalar_lea.hbm %s6639_s0, 8192 }
  0x93   : > { %p5128_p12 = scmp.ne.s32.totalorder %s5684_s29, %s5127_s12  ;;  %p5133_p2 = scmp.lt.u32.totalorder %s5684_s29, %s6639_s0 }
  0x94   : > { %p5134_p1 = scmp.lt.u32.totalorder %s5132_s4, %s5127_s12  ;;  %p5136_p7 = scmp.lt.u32.totalorder %s5127_s12, %s5684_s29 }
  0x95   : > { %p5130_p11 = pnand %p5129_p3, %p5128_p12 }
  0x96   : > { %p5135_p5 = por %p5134_p1, %p5133_p2 }
  0x97   : > { %p5131_p9 = pneg %p5130_p11 }
  0x98   : > { %p5137_p6 = por %p5136_p7, %p5135_p5 }
  0x9a   : > { %p5138_p4 = pnand %p5137_p6, %p5131_p9 }
  0x9c   : > { %5141 = shalt.err (!%p5138_p4)
}
  0x9d   : > { %s5142_s15 = scalar_lea.vmem %s5686_s9, 1024  ;;  %s5317_s21 = smov [#allocation8]  }
  0x9e   : > { %p5143_p0 = scmp.ne.s32.totalorder %s5686_s9, %s5142_s15  ;;  %s5147_s2 = sshll.u32 %s5317_s21, 4  ;;  %s5148_s2 = int_to_ptr.vmem [resolvable:$false] %s5147_s2 }
  0x9f   : > { %s5149_s30 = scalar_lea.vmem %s5148_s2, 2048  ;;  %p5150_p8 = scmp.lt.s32.totalorder %s5686_s9, %s5148_s2 }
  0xa0   : > { %p5145_p12 = pnand %p5143_p0, %p5129_p3  ;;  %p5151_p2 = scmp.lt.s32.totalorder %s5149_s30, %s5142_s15 }
  0xa2   : > { %p5146_p11 = pneg %p5145_p12  ;;  %p5152_p1 = por %p5151_p2, %p5150_p8 }
  0xa4   : > { %p5153_p5 = pnand %p5152_p1, %p5146_p11 }
  0xa6   : > { %5156 = shalt.err (!%p5153_p5)
}
  0xa7   : > { %4883 = dma.hbm_to_vmem [thread:$0]  (!%p5692_p10), %s5684_s29, 1024, %s5686_s9, %s5532_s3, %s6631_s25, %s6631_s25, %s6630_s11  }
  0xa8   : > { %485 = sbr.rel (%p5567_p13) target bundleno = 1205 (0x4b5), region = 68  ;;  %s5728_s7 = sand.u32 (!%p5567_p13), 1, %s5287_s28  }
  0xa9   : > { %s3887_s12 = sshll.u32 (!%p5567_p13), %s5728_s7, 7  ;;  %s488_s14 = scalar_lea.sflag (!%p5567_p13), [#allocation4], %s5728_s7 }
  0xaa   : > { %s5734_s19 = scalar_lea.vmem (!%p5567_p13), [#allocation3], %s3887_s12  ;;  %p6642_p8 = scmp.ne.s32.totalorder (!%p5567_p13), %s6624_s5, 0 }
  0xaf   : > { %5242 = dma.done.wait (%p6642_p8), %s488_s14, 2048  }
  0xb0   : > { %5244 = vsyncadd (%p6642_p8), %s488_s14, 4294965248  ;;  %s6643_s29 = sld [smem:[#allocation14_spill]]  ;;  %s6644_s9 = sld [smem:[#allocation23_spill]] }
  0xb1   : > { %s496_s3 = sand.u32 1, %s5458_s17  }
  0xb2   : > { %s497_s25 = scalar_lea.sflag [#allocation7], %s496_s3 }
  0xb6   : > { %s498_s10 = sand.u32 1, %s6643_s29   ;;  %p6645_p13 = scmp.ne.s32.totalorder %s6644_s9, 0 }
  0xb7   : > { %s3888_s11 = sshll.u32 %s498_s10, 6 }
  0xb8   : > { %s5742_s20 = scalar_lea.vmem [#allocation6], %s3888_s11 }
  0xb9   : > { %5246 = dma.done.wait (%p6645_p13), %s497_s25, 1024  }
  0xba   : > { %5248 = vsyncadd (%p6645_p13), %s497_s25, 4294966272  ;;  %s507_s4 = sand.u32 1, %s5263_s22   ;;  %p6646_p10 = scmp.ne.s32.totalorder %s6638_s6, 0 }
  0xbb   : > { %s3889_s13 = sshll.u32 %s507_s4, 6 }
  0xbc   : > { %s5749_s5 = scalar_lea.vmem [#allocation8], %s3889_s13 }
  0xbd   : > { %5250 = dma.done.wait (%p6646_p10), %s497_s25, 1024  }
  0xbe   : > { %5252 = vsyncadd (%p6646_p10), %s497_s25, 4294966272  ;;  %s6647_s17 = sld [smem:[#allocation16_spill]]  ;;  %s6648_s29 = sld [smem:[#allocation29_spill]]  ;;  %v632_v4 = vld [vmem:[%s5742_s20] sm:$0xff]  ;;  %v633_v5 = vld [vmem:[%s5742_s20 + $0x8] sm:$0xff]  ;;  %vm1342_vm0 = vcmask 261120  }
  0xbf   : > { %v640_v7 = vpack.c.bf16 %v632_v4, %v632_v4  ;;  %v641_v8 = vpack.c.bf16 %v633_v5, %v633_v5  ;;  %v634_v15 = vld [vmem:[%s5742_s20 + $0x10] sm:$0xff]  ;;  %v635_v16 = vld [vmem:[%s5742_s20 + $0x18] sm:$0xff]  ;;  %v636_v17 = vld [vmem:[%s5742_s20 + $0x20] sm:$0xff]  ;;  %vm1344_vm1 = vcmask 254976   ;;  %s6409_s10 = scalar_lea.vmem [#allocation9], %s3887_s12  ;;  %s6659_s12 = sld [smem:[#allocation17_spill]] }
  0xc0   : > { %v637_v18 = vld [vmem:[%s5742_s20 + $0x28] sm:$0xff]  ;;  %v642_v19 = vpack.c.bf16 %v634_v15, %v634_v15  ;;  %v643_v20 = vpack.c.bf16 %v635_v16, %v635_v16  ;;  %v644_v21 = vpack.c.bf16 %v636_v17, %v636_v17  ;;  %v638_v26 = vld [vmem:[%s5742_s20 + $0x30] sm:$0xff]  ;;  %v639_v29 = vld [vmem:[%s5742_s20 + $0x38] sm:$0xff]  ;;  %s6656_s20 = sld [smem:[#allocation35_spill]]  ;;  %p6661_p0 = scmp.ne.s32.totalorder %s6625_s8, 0 }
  0xc1   : > { %v645_v22 = vpack.c.bf16 %v637_v18, %v637_v18  ;;  %v646_v32 = vpack.c.bf16 %v638_v26, %v638_v26  ;;  %v647_v33 = vpack.c.bf16 %v639_v29, %v639_v29  ;;  %v571_v39 = vld [vmem:[%s5734_s19] sm:$0xff]  ;;  %v572_v40 = vld [vmem:[%s5734_s19 + $0x8] sm:$0xff]  ;;  %v573_v44 = vld [vmem:[%s5734_s19 + $0x10] sm:$0xff] }
  0xc2   : > { %v4181_v43 = vpack.c.bf16 %v572_v40, %v571_v39  ;;  %v574_v45 = vld [vmem:[%s5734_s19 + $0x18] sm:$0xff]  ;;  %v575_v47 = vld [vmem:[%s5734_s19 + $0x20] sm:$0xff]  ;;  %v576_v48 = vld [vmem:[%s5734_s19 + $0x28] sm:$0xff] }
  0xc3   : > { %v4182_v49 = vpack.c.bf16 %v574_v45, %v573_v44  ;;  %v4183_v50 = vpack.c.bf16 %v576_v48, %v575_v47  ;;  %v577_v52 = vld [vmem:[%s5734_s19 + $0x30] sm:$0xff]  ;;  %v578_v53 = vld [vmem:[%s5734_s19 + $0x38] sm:$0xff]  ;;  %v579_v60 = vld [vmem:[%s5734_s19 + $0x40] sm:$0xff] }
  0xc4   : > { %p620_p3 = scmp.gt.s32.totalorder %s6647_s17, 0  ;;  %s6649_s9 = smov %s6648_s29  ;;  %v5007_v0 = vld [vmem:[%s6648_s29] sm:$0xff]   ;;  %v4184_v55 = vpack.c.bf16 %v578_v53, %v577_v52  ;;  %v580_v61 = vld [vmem:[%s5734_s19 + $0x48] sm:$0xff] }
  0xc5   : > { %v5008_v1 = vld [vmem:[%s6649_s9 + $0x8] sm:$0xff]   ;;  %4410 = vmatprep.subr.bf16.mxu0 %v5007_v0  ;;  %v5009_v2 = vld [vmem:[%s6649_s9 + $0x10] sm:$0xff]   ;;  %v5010_v3 = vld [vmem:[%s6649_s9 + $0x18] sm:$0xff]   ;;  %p1038_p7 = scmp.lt.s32.totalorder %s6647_s17, 1  ;;  %v4185_v62 = vpack.c.bf16 %v580_v61, %v579_v60  ;;  %s4176_s25 = sshll.u32 %s6659_s12, 5 }
  0xc6   : > { %s621_s24 = scalar_select %p620_p3, 1.0, 0.0  ;;  %4411 = vmatpush3.bf16.msra.mxu0 %v5007_v0  ;;  %v5011_v11 = vld [vmem:[%s6649_s9 + $0x20] sm:$0xff]   ;;  %v5012_v13 = vld [vmem:[%s6649_s9 + $0x28] sm:$0xff]   ;;  %v5013_v14 = vld [vmem:[%s6649_s9 + $0x30] sm:$0xff]  }
  0xc7   : > { %4412 = vmatprep.subr.bf16.mxu0 %v5008_v1  ;;  %v5014_v23 = vld [vmem:[%s6649_s9 + $0x38] sm:$0xff]   ;;  %v5015_v30 = vld [vmem:[%s6649_s9 + $0x40] sm:$0xff]   ;;  %v5016_v35 = vld [vmem:[%s6649_s9 + $0x48] sm:$0xff]   ;;  %s5827_s30 = scalar_select %p1038_p7, 1.0, 0.0 }
  0xc8   : > { %s624_s15 = sshrl.u32 %s621_s24, 16  ;;  %p623_p9 = scmp.ne.f32.partialorder %s621_s24, %s621_s24  ;;  %v5017_v38 = vld [vmem:[%s6649_s9 + $0x50] sm:$0xff]   ;;  %v5018_v42 = vld [vmem:[%s6649_s9 + $0x58] sm:$0xff]   ;;  %v5019_v46 = vld [vmem:[%s6649_s9 + $0x60] sm:$0xff]  }
  0xc9   : > { %s625_s21 = sand.u32 1, %s624_s15  ;;  %v5020_v51 = vld [vmem:[%s6649_s9 + $0x68] sm:$0xff]   ;;  %v5021_v54 = vld [vmem:[%s6649_s9 + $0x70] sm:$0xff]   ;;  %v5022_v56 = vld [vmem:[%s6649_s9 + $0x78] sm:$0xff]   ;;  %s1042_s14 = sshrl.u32 %s5827_s30, 16 }
  0xca   : > { %s626_s2 = sadd.s32 32767, %s625_s21  ;;  %4413 = vmatpush3.bf16.msra.mxu0 %v5008_v1  ;;  %v5023_v57 = vld [vmem:[%s6649_s9 + $0x80] sm:$0xff]   ;;  %v5024_v58 = vld [vmem:[%s6649_s9 + $0x88] sm:$0xff]   ;;  %v5025_v59 = vld [vmem:[%s6649_s9 + $0x90] sm:$0xff]   ;;  %s1043_s29 = sand.u32 1, %s1042_s14 }
  0xcb   : > { %s627_s3 = sadd.s32 %s626_s2, %s621_s24  ;;  %4414 = vmatprep.subr.bf16.mxu0 %v5009_v2  ;;  %v5026_v63 = vld [vmem:[%s6649_s9 + $0x98] sm:$0xff]   ;;  %s1044_s11 = sadd.s32 32767, %s1043_s29  ;;  %v581_v0 = vld [vmem:[%s5734_s19 + $0x50] sm:$0xff]  ;;  %v584_v4 = vld [vmem:[%s5734_s19 + $0x68] sm:$0xff] }
  0xcc   : > { %s628_s6 = sand.u32 4294901760, %s627_s3  ;;  %v582_v1 = vld [vmem:[%s5734_s19 + $0x58] sm:$0xff]  ;;  %s1045_s4 = sadd.s32 %s1044_s11, %s5827_s30 }
  0xcd   : > { %s6694_s6 = smov (%p623_p9, %s628_s6), 2143289344  ;;  %v4186_v5 = vpack.c.bf16 %v582_v1, %v581_v0  ;;  %p1041_p6 = scmp.ne.f32.partialorder %s5827_s30, %s5827_s30 }
  0xce   : > { %s631_s13 = sshrl.u32 %s6694_s6, 16  ;;  %4415 = vmatpush3.bf16.msra.mxu0 %v5009_v2  ;;  %v5027_v2 = vld [vmem:[%s6649_s9 + $0xa0] sm:$0xff]   ;;  %s6650_s11 = sld [smem:[#allocation30_spill]] }
  0xcf   : > { %s648_s15 = sshll.u32 %s631_s13, 16  ;;  %4416 = vmatprep.subr.bf16.mxu0 %v5010_v3  ;;  %s6652_s6 = sld [smem:[#allocation33_spill]] }
  0xd0   : > { %s649_s21 = sor.u32 %s648_s15, %s631_s13  ;;  %s6653_s14 = sld [smem:[#allocation31_spill]] }
  0xd1   : > { %v650_v6 = vstv %s649_s21  ;;  %s1046_s21 = sand.u32 4294901760, %s1045_s4  ;;  %s6655_s13 = sld [smem:[#allocation34_spill]] }
  0xd2   : > { %v652_v9 = vmul.bf16 %v650_v6, %v640_v7  ;;  %v653_v10 = vmul.bf16 %v650_v6, %v641_v8  ;;  %4417 = vmatpush3.bf16.msra.mxu0 %v5010_v3  ;;  %v654_v24 = vmul.bf16 %v650_v6, %v642_v19  ;;  %v655_v25 = vmul.bf16 %v650_v6, %v643_v20  ;;  %v583_v3 = vld [vmem:[%s5734_s19 + $0x60] sm:$0xff]  ;;  %v5028_v7 = vld [vmem:[%s6649_s9 + $0xa8] sm:$0xff]   ;;  %v585_v8 = vld [vmem:[%s5734_s19 + $0x70] sm:$0xff]  ;;  %s6696_s21 = smov (%p1041_p6, %s1046_s21), 2143289344  ;;  %s6657_s2 = sld [smem:[#allocation36_spill]] }
  0xd3   : > { %4418 = vmatprep.subr.bf16.mxu0 %v5011_v11  ;;  %v656_v27 = vmul.bf16 %v650_v6, %v644_v21  ;;  %v657_v28 = vmul.bf16 %v650_v6, %v645_v22  ;;  %v658_v36 = vmul.bf16 %v650_v6, %v646_v32  ;;  %v659_v37 = vmul.bf16 %v650_v6, %v647_v33  ;;  %s1049_s30 = sshrl.u32 %s6696_s21, 16  ;;  %v1052_v20 = vld [vmem:[%s5749_s5 + $0x10] sm:$0xff]  ;;  %v1053_v21 = vld [vmem:[%s5749_s5 + $0x18] sm:$0xff]  ;;  %v1054_v22 = vld [vmem:[%s5749_s5 + $0x20] sm:$0xff]  ;;  %s3721_s4 = sshll.u32 %s6409_s10, 4  ;;  %s6463_s4 = int_to_ptr.vmem [resolvable:$true] %s3721_s4 }
  0xd4   : > { %v3907_v12 = vcombine.low %v652_v9, %v653_v10  ;;  %v3908_v31 = vcombine.low %v654_v24, %v655_v25  ;;  %v4187_v6 = vpack.c.bf16 %v584_v4, %v583_v3  ;;  %v586_v9 = vld [vmem:[%s5734_s19 + $0x78] sm:$0xff]  ;;  %v5029_v10 = vld [vmem:[%s6649_s9 + $0xb0] sm:$0xff]   ;;  %s1066_s29 = sshll.u32 %s1049_s30, 16  ;;  %v1060_v24 = vpack.c.bf16 %v1052_v20, %v1052_v20  ;;  %v5032_v44 = vld [vmem:[%s6650_s11 + $0x20] sm:$0xff]  }
  0xd5   : > { %v3909_v34 = vcombine.low %v656_v27, %v657_v28  ;;  %v3910_v41 = vcombine.low %v658_v36, %v659_v37  ;;  %s1067_s3 = sor.u32 %s1066_s29, %s1049_s30  ;;  %v1061_v25 = vpack.c.bf16 %v1053_v21, %v1053_v21  ;;  %v1062_v27 = vpack.c.bf16 %v1054_v22, %v1054_v22  ;;  %v1056_v33 = vld [vmem:[%s5749_s5 + $0x30] sm:$0xff]  ;;  %4546 = vmatprep.subr.bf16.mxu1 %v5032_v44  ;;  %v5033_v45 = vld [vmem:[%s6650_s11 + $0x18] sm:$0xff]   ;;  %v5928_v48 = vld [vmem:[%s6650_s11] sm:$0xff]   ;;  %s3705_s30 = scalar_lea.sflag [#allocation5], %s5728_s7 }
  0xd6   : > { %4426 = vmatprep.mubr.bf16.mxu0 %v3907_v12  ;;  %4419 = vmatpush3.bf16.msra.mxu0 %v5011_v11  ;;  %v4188_v11 = vpack.c.bf16 %v586_v9, %v585_v8  ;;  %v5030_v12 = vld [vmem:[%s6649_s9 + $0xb8] sm:$0xff]   ;;  %v1068_v17 = vstv %s1067_s3  ;;  %v1064_v36 = vpack.c.bf16 %v1056_v33, %v1056_v33  ;;  %v5922_v47 = vld [vmem:[%s6650_s11 + $0x30] sm:$0xff]   ;;  %s6651_s3 = sld [smem:[#allocation32_spill]] }
  0xd7   : > { %4420 = vmatprep.subr.bf16.mxu0 %v5012_v13  ;;  %v1072_v29 = vmul.bf16 %v1068_v17, %v1060_v24  ;;  %4547 = vmatpush3.bf16.msra.mxu1 %v5032_v44 }
  0xd8   : > { %v1076_v39 = vmul.bf16 %v1068_v17, %v1064_v36 }
  0xda   : > { %4421 = vmatpush3.bf16.msra.mxu0 %v5012_v13  ;;  %v1050_v13 = vld [vmem:[%s5749_s5] sm:$0xff] }
  0xdb   : > { %4422 = vmatprep.subr.bf16.mxu0 %v5013_v14  ;;  %v1058_v15 = vpack.c.bf16 %v1050_v13, %v1050_v13 }
  0xdd   : > { %v1070_v18 = vmul.bf16 %v1068_v17, %v1058_v15 }
  0xde   : > { %4423 = vmatpush3.bf16.msra.mxu0 %v5013_v14  ;;  %v1051_v14 = vld [vmem:[%s5749_s5 + $0x8] sm:$0xff] }
  0xdf   : > { %4424 = vmatprep.subr.bf16.mxu0 %v5014_v23  ;;  %v1059_v16 = vpack.c.bf16 %v1051_v14, %v1051_v14 }
  0xe1   : > { %v1071_v19 = vmul.bf16 %v1068_v17, %v1059_v16 }
  0xe2   : > { %4425 = vmatpush3.bf16.msra.mxu0 %v5014_v23  ;;  %v1055_v23 = vld [vmem:[%s5749_s5 + $0x28] sm:$0xff] }
  0xe3   : > { %4442 = vmatprep.subr.bf16.mxu0 %v5015_v30  ;;  %v3951_v26 = vcombine.low %v1070_v18, %v1071_v19  ;;  %v1063_v28 = vpack.c.bf16 %v1055_v23, %v1055_v23 }
  0xe5   : > { %4427 = vmatmul.mubr.bf16.vlgmr.msra.gmra.mrb[0].mxu0 %v3908_v31  ;;  %v1074_v31 = vmul.bf16 %v1068_v17, %v1062_v27  ;;  %v1075_v32 = vmul.bf16 %v1068_v17, %v1063_v28 }
  0xe6   : > { %4443 = vmatpush3.bf16.msra.mxu0 %v5015_v30  ;;  %4430 = vmatprep.mubr.bf16.mxu0 %v3909_v34  ;;  %v1073_v30 = vmul.bf16 %v1068_v17, %v1061_v25  ;;  %v1057_v34 = vld [vmem:[%s5749_s5 + $0x38] sm:$0xff]  ;;  %s6658_s5 = sld [smem:[#allocation37_spill]] }
  0xe7   : > { %4444 = vmatprep.subr.bf16.mxu0 %v5016_v35  ;;  %v1065_v37 = vpack.c.bf16 %v1057_v34, %v1057_v34 }
  0xe9   : > { %v1077_v40 = vmul.bf16 %v1068_v17, %v1065_v37 }
  0xea   : > { %4445 = vmatpush3.bf16.msra.mxu0 %v5016_v35  ;;  %v3952_v35 = vcombine.low %v1072_v29, %v1073_v30 }
  0xeb   : > { %4446 = vmatprep.subr.bf16.mxu0 %v5017_v38 }
  0xed   : > { %4431 = vmatmul.mubr.bf16.gmra.mrb[4].mxu0 %v3910_v41  ;;  %v3954_v41 = vcombine.low %v1076_v39, %v1077_v40  ;;  %v5038_v39 = vld [vmem:[%s6650_s11 + $0x8] sm:$0xff]  }
  0xee   : > { %4447 = vmatpush3.bf16.msra.mxu0 %v5017_v38  ;;  %4434 = vmatprep.mubr.bf16.mxu0 %v4181_v43  ;;  %v3953_v38 = vcombine.low %v1074_v31, %v1075_v32 }
  0xef   : > { %4448 = vmatprep.subr.bf16.mxu0 %v5018_v42 }
  0xf2   : > { %4449 = vmatpush3.bf16.msra.mxu0 %v5018_v42  ;;  %v5318_v42 = vmov 0.0  }
  0xf3   : > { %4450 = vmatprep.subr.bf16.mxu0 %v5019_v46  ;;  %1350 = vst.msk [vmem:[#allocation2 + $0x30] sm:$0xff] %vm1342_vm0, %v5318_v42  ;;  %1343 = vst.msk [vmem:[#allocation2] sm:$0xff] %vm1342_vm0, %v5318_v42 }
  0xf4   : > { %1351 = vst.msk [vmem:[#allocation2 + $0x38] sm:$0x3] %vm1344_vm1, %v5318_v42  ;;  %1345 = vst.msk [vmem:[#allocation2 + $0x8] sm:$0x3] %vm1344_vm1, %v5318_v42 }
  0xf5   : > { %4435 = vmatmul.mubr.bf16.gmra.mrb[8].mxu0 %v4182_v49  ;;  %1346 = vst.msk [vmem:[#allocation2 + $0x10] sm:$0xff] %vm1342_vm0, %v5318_v42  ;;  %1348 = vst.msk [vmem:[#allocation2 + $0x20] sm:$0xff] %vm1342_vm0, %v5318_v42 }
  0xf6   : > { %4451 = vmatpush3.bf16.msra.mxu0 %v5019_v46  ;;  %4438 = vmatprep.mubr.bf16.mxu0 %v4183_v50  ;;  %1347 = vst.msk [vmem:[#allocation2 + $0x18] sm:$0x3] %vm1344_vm1, %v5318_v42  ;;  %1349 = vst.msk [vmem:[#allocation2 + $0x28] sm:$0x3] %vm1344_vm1, %v5318_v42  ;;  %v5034_v46 = vld [vmem:[%s6650_s11 + $0x28] sm:$0xff]  }
  0xf7   : > { %4452 = vmatprep.subr.bf16.mxu0 %v5020_v51  ;;  %1352 = vst.msk [vmem:[#allocation2 + $0x40] sm:$0xff] %vm1342_vm0, %v5318_v42  ;;  %1354 = vst.msk [vmem:[#allocation2 + $0x50] sm:$0xff] %vm1342_vm0, %v5318_v42  ;;  %4548 = vmatprep.subr.bf16.mxu1 %v5034_v46 }
  0xf8   : > { %1353 = vst.msk [vmem:[#allocation2 + $0x48] sm:$0x3] %vm1344_vm1, %v5318_v42  ;;  %1355 = vst.msk [vmem:[#allocation2 + $0x58] sm:$0x3] %vm1344_vm1, %v5318_v42  ;;  %4549 = vmatpush3.bf16.msra.mxu1 %v5034_v46 }
  0xf9   : > { %1356 = vst.msk [vmem:[#allocation2 + $0x60] sm:$0xff] %vm1342_vm0, %v5318_v42  ;;  %1358 = vst.msk [vmem:[#allocation2 + $0x70] sm:$0xff] %vm1342_vm0, %v5318_v42  ;;  %4566 = vmatprep.subr.bf16.mxu1 %v5922_v47 }
  0xfa   : > { %4453 = vmatpush3.bf16.msra.mxu0 %v5020_v51  ;;  %1357 = vst.msk [vmem:[#allocation2 + $0x68] sm:$0x3] %vm1344_vm1, %v5318_v42  ;;  %1359 = vst.msk [vmem:[#allocation2 + $0x78] sm:$0x3] %vm1344_vm1, %v5318_v42  ;;  %v5939_v51 = vld [vmem:[%s6652_s6] ss:$0 sm:$0xff] }
  0xfb   : > { %4454 = vmatprep.subr.bf16.mxu0 %v5021_v54  ;;  %1360 = vst.msk [vmem:[#allocation2 + $0x80] sm:$0xff] %vm1342_vm0, %v5318_v42  ;;  %1362 = vst.msk [vmem:[#allocation2 + $0x90] sm:$0xff] %vm1342_vm0, %v5318_v42  ;;  %v1437_v15 = vld [vmem:[#allocation2 + $0x1] sm:$0xff]  ;;  %s4261_s6 = sshll.u32 %s6647_s17, 4 }
  0xfc   : > { %1361 = vst.msk [vmem:[#allocation2 + $0x88] sm:$0x3] %vm1344_vm1, %v5318_v42  ;;  %1363 = vst.msk [vmem:[#allocation2 + $0x98] sm:$0x3] %vm1344_vm1, %v5318_v42  ;;  %v1820_v16 = vld [vmem:[#allocation2 + $0x2] sm:$0xff]  ;;  %s3718_s17 = sadd.s32 %s4261_s6, %s4176_s25 }
  0xfd   : > { %4439 = vmatmul.mubr.bf16.gmra.mrb[12].mxu0 %v4184_v55  ;;  %1364 = vst.msk [vmem:[#allocation2 + $0xa0] sm:$0xff] %vm1342_vm0, %v5318_v42  ;;  %1366 = vst.msk [vmem:[#allocation2 + $0xb0] sm:$0xff] %vm1342_vm0, %v5318_v42 }
  0xfe   : > { %4455 = vmatpush3.bf16.msra.mxu0 %v5021_v54  ;;  %4458 = vmatprep.mubr.bf16.mxu0 %v4181_v43  ;;  %1365 = vst.msk [vmem:[#allocation2 + $0xa8] sm:$0x3] %vm1344_vm1, %v5318_v42  ;;  %1367 = vst.msk [vmem:[#allocation2 + $0xb8] sm:$0x3] %vm1344_vm1, %v5318_v42  ;;  %v5031_v43 = vld [vmem:[%s6650_s11 + $0x10] sm:$0xff]  }
  0xff   : > { %4456 = vmatprep.subr.bf16.mxu0 %v5022_v56  ;;  %1368 = vst.msk [vmem:[#allocation2 + $0xc0] sm:$0xff] %vm1342_vm0, %v5318_v42  ;;  %1370 = vst.msk [vmem:[#allocation2 + $0xd0] sm:$0xff] %vm1342_vm0, %v5318_v42 }
 0x100   : > { %1369 = vst.msk [vmem:[#allocation2 + $0xc8] sm:$0x3] %vm1344_vm1, %v5318_v42  ;;  %1371 = vst.msk [vmem:[#allocation2 + $0xd8] sm:$0x3] %vm1344_vm1, %v5318_v42 }
 0x101   : > { %1372 = vst.msk [vmem:[#allocation2 + $0xe0] sm:$0xff] %vm1342_vm0, %v5318_v42  ;;  %1374 = vst.msk [vmem:[#allocation2 + $0xf0] sm:$0xff] %vm1342_vm0, %v5318_v42 }
 0x102   : > { %4457 = vmatpush3.bf16.msra.mxu0 %v5022_v56  ;;  %1373 = vst.msk [vmem:[#allocation2 + $0xe8] sm:$0x3] %vm1344_vm1, %v5318_v42  ;;  %1375 = vst.msk [vmem:[#allocation2 + $0xf8] sm:$0x3] %vm1344_vm1, %v5318_v42 }
 0x103   : > { %4474 = vmatprep.subr.bf16.mxu0 %v5023_v57  ;;  %1376 = vst.msk [vmem:[#allocation2 + $0x100] sm:$0xff] %vm1342_vm0, %v5318_v42  ;;  %1378 = vst.msk [vmem:[#allocation2 + $0x110] sm:$0xff] %vm1342_vm0, %v5318_v42 }
 0x104   : > { %1377 = vst.msk [vmem:[#allocation2 + $0x108] sm:$0x3] %vm1344_vm1, %v5318_v42  ;;  %1379 = vst.msk [vmem:[#allocation2 + $0x118] sm:$0x3] %vm1344_vm1, %v5318_v42 }
 0x105   : > { %4459 = vmatmul.mubr.bf16.vlgmr.msra.gmra.mrb[0].mxu0 %v4182_v49  ;;  %1380 = vst.msk [vmem:[#allocation2 + $0x120] sm:$0xff] %vm1342_vm0, %v5318_v42  ;;  %1382 = vst.msk [vmem:[#allocation2 + $0x130] sm:$0xff] %vm1342_vm0, %v5318_v42  ;;  %v5934_v49 = vld [vmem:[%s6651_s3] ss:$0 sm:$0xff]  ;;  %s6654_s3 = smov %s6653_s14 }
 0x106   : > { %4475 = vmatpush3.bf16.msra.mxu0 %v5023_v57  ;;  %4462 = vmatprep.mubr.bf16.mxu0 %v4183_v50  ;;  %1381 = vst.msk [vmem:[#allocation2 + $0x128] sm:$0x3] %vm1344_vm1, %v5318_v42  ;;  %1383 = vst.msk [vmem:[#allocation2 + $0x138] sm:$0x3] %vm1344_vm1, %v5318_v42 }
 0x107   : > { %4476 = vmatprep.subr.bf16.mxu0 %v5024_v58 }
 0x10a   : > { %4477 = vmatpush3.bf16.msra.mxu0 %v5024_v58 }
 0x10b   : > { %4478 = vmatprep.subr.bf16.mxu0 %v5025_v59 }
 0x10d   : > { %4463 = vmatmul.mubr.bf16.gmra.mrb[4].mxu0 %v4184_v55 }
 0x10e   : > { %4479 = vmatpush3.bf16.msra.mxu0 %v5025_v59  ;;  %4466 = vmatprep.mubr.bf16.mxu0 %v4185_v62 }
 0x10f   : > { %4480 = vmatprep.subr.bf16.mxu0 %v5026_v63 }
 0x112   : > { %4481 = vmatpush3.bf16.msra.mxu0 %v5026_v63 }
 0x113   : > { %4482 = vmatprep.subr.bf16.mxu0 %v5027_v2 }
 0x115   : > { %4467 = vmatmul.mubr.bf16.gmra.mrb[8].mxu0 %v4186_v5 }
 0x116   : > { %4483 = vmatpush3.bf16.msra.mxu0 %v5027_v2  ;;  %4470 = vmatprep.mubr.bf16.mxu0 %v4187_v6 }
 0x117   : > { %4484 = vmatprep.subr.bf16.mxu0 %v5028_v7 }
 0x11a   : > { %4485 = vmatpush3.bf16.msra.mxu0 %v5028_v7 }
 0x11b   : > { %4486 = vmatprep.subr.bf16.mxu0 %v5029_v10 }
 0x11d   : > { %4471 = vmatmul.mubr.bf16.gmra.mrb[12].mxu0 %v4188_v11 }
 0x11e   : > { %4487 = vmatpush3.bf16.msra.mxu0 %v5029_v10  ;;  %4490 = vmatprep.mubr.bf16.mxu0 %v4185_v62 }
 0x11f   : > { %4488 = vmatprep.subr.bf16.mxu0 %v5030_v12 }
 0x122   : > { %4489 = vmatpush3.bf16.msra.mxu0 %v5030_v12 }
 0x123   : > { %4506 = vmatprep.subr.bf16.mxu0 %v5031_v43 }
 0x125   : > { %4491 = vmatmul.mubr.bf16.vlgmr.msra.gmra.mrb[0].mxu0 %v4186_v5 }
 0x126   : > { %4494 = vmatprep.mubr.bf16.mxu0 %v4187_v6  ;;  %4507 = vmatpush3.bf16.msra.mxu0 %v5031_v43 }
 0x127   : > { %4508 = vmatprep.subr.bf16.mxu0 %v5033_v45 }
 0x12a   : > { %4509 = vmatpush3.bf16.msra.mxu0 %v5033_v45 }
 0x12b   : > { %4526 = vmatprep.subr.bf16.mxu0 %v5928_v48 }
 0x12d   : > { %4495 = vmatmul.mubr.bf16.gmra.mrb[4].mxu0 %v4188_v11 }
 0x12e   : > { %4498 = vmatprep.mubr.bf16.mxu0 %v3951_v26 }
 0x135   : > { %4499 = vmatmul.mubr.bf16.gmra.mrb[8].mxu0 %v3952_v35 }
 0x136   : > { %4502 = vmatprep.mubr.bf16.mxu0 %v3953_v38  ;;  %v5036_v38 = vld [vmem:[%s6650_s11 + $0x38] sm:$0xff]  }
 0x13d   : > { %4503 = vmatmul.mubr.bf16.gmra.mrb[12].mxu0 %v3954_v41 }
 0x1f8   : > { %v4492_v50 = vpop.f32.mrb[0].mxu0 }
 0x1f9   : > { %v1289_v52 = vmul.f32 %v4492_v50, %v5934_v49  ;;  %v1201_v53 = vpop.f32.mrb[1].mxu0 }
 0x1fa   : > { %v1287_v54 = vmul.f32 %v5934_v49, %v1201_v53  ;;  %v4493_v55 = vpop.f32.mrb[2].mxu0 }
 0x1fb   : > { %v1312_v56 = vadd.f32 %v5939_v51, %v1289_v52  ;;  %v1290_v57 = vmul.f32 %v4493_v55, %v5934_v49  ;;  %v1204_v58 = vpop.f32.mrb[3].mxu0 }
 0x1fc   : > { %v1310_v59 = vadd.f32 %v5939_v51, %v1287_v54  ;;  %v1288_v60 = vmul.f32 %v5934_v49, %v1204_v58  ;;  %v6018_v54 = vld [vmem:[%s6650_s11 + $0x40] sm:$0xff]  }
 0x1fd   : > { %v1328_v61 = vmax.f32 %v1312_v56, 0.0  ;;  %v1313_v62 = vadd.f32 %v5939_v51, %v1290_v57 }
 0x1fe   : > { %v1326_v63 = vmax.f32 %v1310_v59, 0.0  ;;  %v1311_v0 = vadd.f32 %v5939_v51, %v1288_v60 }
 0x1ff   : > { %1387 = vst.msk [vmem:[#allocation2 + $0x31] sm:$0xff] %vm1342_vm0, %v1328_v61  ;;  %v1329_v1 = vmax.f32 %v1313_v62, 0.0 }
 0x200   : > { %1385 = vst.msk [vmem:[#allocation2 + $0x11] sm:$0xff] %vm1342_vm0, %v1326_v63  ;;  %v1327_v2 = vmax.f32 %v1311_v0, 0.0  ;;  %v4496_v3 = vpop.f32.mrb[4].mxu0 }
 0x201   : > { %1388 = vst.msk [vmem:[#allocation2 + $0x41] sm:$0xff] %vm1342_vm0, %v1329_v1  ;;  %v1293_v4 = vmul.f32 %v4496_v3, %v5934_v49  ;;  %v1217_v5 = vpop.f32.mrb[5].mxu0 }
 0x202   : > { %1386 = vst.msk [vmem:[#allocation2 + $0x21] sm:$0xff] %vm1342_vm0, %v1327_v2  ;;  %v1291_v6 = vmul.f32 %v5934_v49, %v1217_v5  ;;  %v4497_v7 = vpop.f32.mrb[6].mxu0 }
 0x203   : > { %v1316_v8 = vadd.f32 %v5939_v51, %v1293_v4  ;;  %v1294_v9 = vmul.f32 %v4497_v7, %v5934_v49  ;;  %v1220_v10 = vpop.f32.mrb[7].mxu0 }
 0x204   : > { %v1314_v11 = vadd.f32 %v5939_v51, %v1291_v6  ;;  %v1292_v12 = vmul.f32 %v5934_v49, %v1220_v10 }
 0x205   : > { %v1332_v13 = vmax.f32 %v1316_v8, 0.0  ;;  %v1317_v14 = vadd.f32 %v5939_v51, %v1294_v9 }
 0x206   : > { %v1330_v17 = vmax.f32 %v1314_v11, 0.0  ;;  %v1315_v18 = vadd.f32 %v5939_v51, %v1292_v12  ;;  %v5969_v26 = vld [vmem:[#allocation2 + $0x32] sm:$0xff] }
 0x207   : > { %1391 = vst.msk [vmem:[#allocation2 + $0x71] sm:$0xff] %vm1342_vm0, %v1332_v13  ;;  %v1333_v19 = vmax.f32 %v1317_v14, 0.0  ;;  %v5962_v20 = vld [vmem:[#allocation2 + $0x11] sm:$0xff]  ;;  %v1445_v14 = vld [vmem:[#allocation2 + $0xa1] sm:$0xff] }
 0x208   : > { %v5964_v21 = vld [vmem:[#allocation2 + $0x12] sm:$0xff]  ;;  %1389 = vst.msk [vmem:[#allocation2 + $0x51] sm:$0xff] %vm1342_vm0, %v1330_v17  ;;  %v1331_v22 = vmax.f32 %v1315_v18, 0.0  ;;  %v4500_v23 = vpop.f32.mrb[8].mxu0  ;;  %v4189_v24 = vpack.c.bf16 %v5962_v20, %v1437_v15  ;;  %v5971_v27 = vld [vmem:[#allocation2 + $0x42] sm:$0xff] }
 0x209   : > { %v4205_v25 = vpack.c.bf16 %v5964_v21, %v1820_v16  ;;  %1392 = vst.msk [vmem:[#allocation2 + $0x81] sm:$0xff] %vm1342_vm0, %v1333_v19  ;;  %v1297_v28 = vmul.f32 %v4500_v23, %v5934_v49  ;;  %v1233_v29 = vpop.f32.mrb[9].mxu0  ;;  %v5975_v30 = vld [vmem:[#allocation2 + $0x21] sm:$0xff]  ;;  %v5977_v31 = vld [vmem:[#allocation2 + $0x31] sm:$0xff]  ;;  %v4230_v33 = vpack.c.bf16 %v5971_v27, %v5969_v26 }
 0x20a   : > { %v5979_v32 = vld [vmem:[#allocation2 + $0x22] sm:$0xff]  ;;  %1390 = vst.msk [vmem:[#allocation2 + $0x61] sm:$0xff] %vm1342_vm0, %v1331_v22  ;;  %v1295_v34 = vmul.f32 %v5934_v49, %v1233_v29  ;;  %v4501_v35 = vpop.f32.mrb[10].mxu0  ;;  %4510 = vmatprep.mubr.msk.bf16.mxu0 %vm1342_vm0, %v4189_v24  ;;  %v5989_v36 = vpack.c.bf16 %v5977_v31, %v5975_v30 }
 0x20b   : > { %4550 = vmatprep.mubr.msk.bf16.mxu1 %vm1342_vm0, %v4205_v25  ;;  %v5993_v37 = vpack.c.bf16 %v5969_v26, %v5979_v32  ;;  %v1320_v40 = vadd.f32 %v5939_v51, %v1297_v28  ;;  %v1298_v41 = vmul.f32 %v4501_v35, %v5934_v49  ;;  %v1236_v42 = vpop.f32.mrb[11].mxu0  ;;  %v4229_v50 = vpack.c.bf16 %v5979_v32, %v5964_v21  ;;  %v6021_v56 = vld [vmem:[#allocation2 + $0x41] sm:$0xff]  ;;  %v5045_v21 = vld [vmem:[%s6650_s11 + $0x70] sm:$0xff]  }
 0x20c   : > { %v1318_v43 = vadd.f32 %v5939_v51, %v1295_v34  ;;  %v1296_v44 = vmul.f32 %v5934_v49, %v1236_v42  ;;  %4511 = vmatmul.mubr.msk.bf16.vlgmr.msra.gmra.mrb[16].mxu0 %vm1342_vm0, %v5989_v36  ;;  %v1828_v15 = vld [vmem:[#allocation2 + $0xa2] sm:$0xff] }
 0x20d   : > { %4551 = vmatmul.mubr.msk.bf16.vlgmr.msra.gmra.mrb[0].mxu1 %vm1342_vm0, %v5993_v37  ;;  %v1336_v45 = vmax.f32 %v1320_v40, 0.0  ;;  %v1321_v46 = vadd.f32 %v5939_v51, %v1298_v41  ;;  %4527 = vmatpush3.bf16.msra.mxu0 %v5928_v48  ;;  %v1401_v42 = vld [vmem:[#allocation2] sm:$0xff] }
 0x20e   : > { %4567 = vmatpush3.bf16.msra.mxu1 %v5922_v47  ;;  %v1334_v52 = vmax.f32 %v1318_v43, 0.0  ;;  %v1319_v53 = vadd.f32 %v5939_v51, %v1296_v44  ;;  %4528 = vmatprep.subr.bf16.mxu0 %v5038_v39  ;;  %v6036_v61 = vld [vmem:[#allocation2 + $0x71] sm:$0xff] }
 0x20f   : > { %4568 = vmatprep.subr.bf16.mxu1 %v5036_v38  ;;  %1395 = vst.msk [vmem:[#allocation2 + $0xd1] sm:$0xff] %vm1342_vm0, %v1336_v45  ;;  %v1337_v55 = vmax.f32 %v1321_v46, 0.0  ;;  %v6023_v47 = vld [vmem:[#allocation2 + $0x51] sm:$0xff] }
 0x210   : > { %v6025_v48 = vld [vmem:[#allocation2 + $0x52] sm:$0xff]  ;;  %1393 = vst.msk [vmem:[#allocation2 + $0xb1] sm:$0xff] %vm1342_vm0, %v1334_v52  ;;  %v1335_v57 = vmax.f32 %v1319_v53, 0.0  ;;  %v4504_v58 = vpop.f32.mrb[12].mxu0  ;;  %v6030_v59 = vpack.c.bf16 %v6023_v47, %v6021_v56  ;;  %v2505_v32 = vld [vmem:[#allocation2 + $0x82] sm:$0xff] }
 0x211   : > { %v6034_v60 = vpack.c.bf16 %v6025_v48, %v5971_v27  ;;  %1396 = vst.msk [vmem:[#allocation2 + $0xe1] sm:$0xff] %vm1342_vm0, %v1337_v55  ;;  %v1301_v62 = vmul.f32 %v4504_v58, %v5934_v49  ;;  %v1249_v63 = vpop.f32.mrb[13].mxu0  ;;  %v6040_v0 = vld [vmem:[#allocation2 + $0x61] sm:$0xff]  ;;  %v6044_v2 = vld [vmem:[#allocation2 + $0x72] sm:$0xff]  ;;  %4529 = vmatpush3.bf16.msra.mxu0 %v5038_v39 }
 0x212   : > { %v6042_v1 = vld [vmem:[#allocation2 + $0x62] sm:$0xff]  ;;  %4569 = vmatpush3.bf16.msra.mxu1 %v5036_v38  ;;  %1394 = vst.msk [vmem:[#allocation2 + $0xc1] sm:$0xff] %vm1342_vm0, %v1335_v57  ;;  %v1299_v3 = vmul.f32 %v5934_v49, %v1249_v63  ;;  %v4505_v4 = vpop.f32.mrb[14].mxu0  ;;  %4514 = vmatprep.mubr.msk.bf16.mxu0 %vm1342_vm0, %v6030_v59  ;;  %v6054_v5 = vpack.c.bf16 %v6036_v61, %v6040_v0  ;;  %v1402_v55 = vld [vmem:[#allocation2 + $0x10] sm:$0xff] }
 0x213   : > { %4554 = vmatprep.mubr.msk.bf16.mxu1 %vm1342_vm0, %v6034_v60  ;;  %v6058_v6 = vpack.c.bf16 %v6044_v2, %v6042_v1  ;;  %v1324_v7 = vadd.f32 %v5939_v51, %v1301_v62  ;;  %v1302_v8 = vmul.f32 %v4505_v4, %v5934_v49  ;;  %v1252_v9 = vpop.f32.mrb[15].mxu0  ;;  %4586 = vmatprep.subr.bf16.mxu1 %v6018_v54  ;;  %v2047_v57 = vld [vmem:[#allocation2 + $0x20] sm:$0xff] }
 0x214   : > { %v1322_v10 = vadd.f32 %v5939_v51, %v1299_v3  ;;  %v1300_v11 = vmul.f32 %v5934_v49, %v1252_v9  ;;  %4515 = vmatmul.mubr.msk.bf16.gmra.mrb[20].mxu0 %vm1342_vm0, %v6054_v5  ;;  %v4231_v16 = vpack.c.bf16 %v6042_v1, %v6025_v48  ;;  %v5047_v48 = vld [vmem:[%s6650_s11 + $0x80] sm:$0xff]   ;;  %v2732_v1 = vld [vmem:[#allocation2 + $0x90] sm:$0xff] }
 0x215   : > { %4555 = vmatmul.mubr.msk.bf16.gmra.mrb[4].mxu1 %vm1342_vm0, %v6058_v6  ;;  %v1340_v12 = vmax.f32 %v1324_v7, 0.0  ;;  %v1325_v13 = vadd.f32 %v5939_v51, %v1302_v8  ;;  %v4197_v7 = vpack.c.bf16 %v1402_v55, %v1401_v42  ;;  %v4213_v8 = vpack.c.bf16 %v2047_v57, %v1402_v55 }
 0x216   : > { %v1338_v17 = vmax.f32 %v1322_v10, 0.0  ;;  %v1323_v18 = vadd.f32 %v5939_v51, %v1300_v11  ;;  %v6081_v28 = vld [vmem:[#allocation2 + $0xd2] sm:$0xff]  ;;  %v2049_v10 = vld [vmem:[#allocation2 + $0x40] sm:$0xff] }
 0x217   : > { %1399 = vst.msk [vmem:[#allocation2 + $0x111] sm:$0xff] %vm1342_vm0, %v1340_v12  ;;  %v1341_v49 = vmax.f32 %v1325_v13, 0.0  ;;  %v6074_v19 = vld [vmem:[#allocation2 + $0xb1] sm:$0xff]  ;;  %v2051_v12 = vld [vmem:[#allocation2 + $0x60] sm:$0xff] }
 0x218   : > { %v6076_v22 = vld [vmem:[#allocation2 + $0xb2] sm:$0xff]  ;;  %1397 = vst.msk [vmem:[#allocation2 + $0xf1] sm:$0xff] %vm1342_vm0, %v1338_v17  ;;  %v1339_v23 = vmax.f32 %v1323_v18, 0.0  ;;  %v4193_v24 = vpack.c.bf16 %v6074_v19, %v1445_v14  ;;  %v6083_v29 = vld [vmem:[#allocation2 + $0xe2] sm:$0xff] }
 0x219   : > { %v4209_v25 = vpack.c.bf16 %v6076_v22, %v1828_v15  ;;  %1400 = vst.msk [vmem:[#allocation2 + $0x121] sm:$0xff] %vm1342_vm0, %v1341_v49  ;;  %v6086_v51 = vld [vmem:[#allocation2 + $0xc1] sm:$0xff]  ;;  %v6088_v34 = vld [vmem:[#allocation2 + $0xd1] sm:$0xff]  ;;  %v4234_v38 = vpack.c.bf16 %v6083_v29, %v6081_v28 }
 0x21a   : > { %v6090_v35 = vld [vmem:[#allocation2 + $0xc2] sm:$0xff]  ;;  %1398 = vst.msk [vmem:[#allocation2 + $0x101] sm:$0xff] %vm1342_vm0, %v1339_v23  ;;  %4518 = vmatprep.mubr.msk.bf16.mxu0 %vm1342_vm0, %v4193_v24  ;;  %v6099_v39 = vpack.c.bf16 %v6088_v34, %v6086_v51  ;;  %v1406_v11 = vld [vmem:[#allocation2 + $0x50] sm:$0xff] }
 0x21b   : > { %4558 = vmatprep.mubr.msk.bf16.mxu1 %vm1342_vm0, %v4209_v25  ;;  %v6103_v40 = vpack.c.bf16 %v6081_v28, %v6090_v35  ;;  %v4233_v41 = vpack.c.bf16 %v6090_v35, %v6076_v22  ;;  %v6111_v43 = vld [vmem:[#allocation2 + $0xe1] sm:$0xff]  ;;  %v1404_v13 = vld [vmem:[#allocation2 + $0x30] sm:$0xff]  ;;  %v6155_v17 = vpack.c.bf16 %v1406_v11, %v2049_v10  ;;  %v4215_v18 = vpack.c.bf16 %v2051_v12, %v1406_v11 }
 0x21c   : > { %4519 = vmatmul.mubr.msk.bf16.gmra.mrb[24].mxu0 %vm1342_vm0, %v6099_v39  ;;  %v6153_v14 = vpack.c.bf16 %v1404_v13, %v2047_v57  ;;  %v4214_v15 = vpack.c.bf16 %v2049_v10, %v1404_v13  ;;  %v5040_v49 = vld [vmem:[%s6650_s11 + $0x48] sm:$0xff]   ;;  %v6167_v23 = vld [vmem:[#allocation2 + $0x80] sm:$0xff]  ;;  %v5041_v24 = vld [vmem:[%s6650_s11 + $0x50] sm:$0xff]  }
 0x21d   : > { %4559 = vmatmul.mubr.msk.bf16.gmra.mrb[8].mxu1 %vm1342_vm0, %v6103_v40  ;;  %v1409_v25 = vld [vmem:[#allocation2 + $0xa0] sm:$0xff]  ;;  %v1410_v42 = vld [vmem:[#allocation2 + $0xb0] sm:$0xff]  ;;  %v5050_v22 = vld [vmem:[%s6654_s3 + $0x8] sm:$0xff]  }
 0x21e   : > { %v6125_v53 = vld [vmem:[#allocation2 + $0x111] sm:$0xff]  ;;  %v2055_v55 = vld [vmem:[#allocation2 + $0xc0] sm:$0xff]  ;;  %v4201_v10 = vpack.c.bf16 %v1410_v42, %v1409_v25 }
 0x21f   : > { %v6113_v44 = vld [vmem:[#allocation2 + $0xf1] sm:$0xff]  ;;  %v4217_v11 = vpack.c.bf16 %v2055_v55, %v1410_v42 }
 0x220   : > { %v6115_v45 = vld [vmem:[#allocation2 + $0xf2] sm:$0xff]  ;;  %v6119_v46 = vpack.c.bf16 %v6113_v44, %v6111_v43  ;;  %v6190_v42 = vld [vmem:[#allocation2 + $0x120] sm:$0xff] }
 0x221   : > { %v6123_v52 = vpack.c.bf16 %v6115_v45, %v6083_v29  ;;  %v6127_v58 = vld [vmem:[#allocation2 + $0x101] sm:$0xff]  ;;  %v6131_v63 = vld [vmem:[#allocation2 + $0x112] sm:$0xff] }
 0x222   : > { %v6129_v62 = vld [vmem:[#allocation2 + $0x102] sm:$0xff]  ;;  %4522 = vmatprep.mubr.msk.bf16.mxu0 %vm1342_vm0, %v6119_v46  ;;  %v6139_v3 = vpack.c.bf16 %v6125_v53, %v6127_v58  ;;  %v1408_v57 = vld [vmem:[#allocation2 + $0x70] sm:$0xff] }
 0x223   : > { %4562 = vmatprep.mubr.msk.bf16.mxu1 %vm1342_vm0, %v6123_v52  ;;  %v6143_v4 = vpack.c.bf16 %v6131_v63, %v6129_v62  ;;  %v4235_v9 = vpack.c.bf16 %v6129_v62, %v6115_v45  ;;  %v1414_v13 = vld [vmem:[#allocation2 + $0xf0] sm:$0xff]  ;;  %v2513_v26 = vld [vmem:[#allocation2 + $0x122] sm:$0xff] }
 0x224   : > { %4523 = vmatmul.mubr.msk.bf16.gmra.mrb[28].mxu0 %vm1342_vm0, %v6139_v3  ;;  %v4236_v27 = vpack.c.bf16 %v2513_v26, %v6131_v63  ;;  %v2740_v28 = vld [vmem:[#allocation2 + $0x130] sm:$0xff] }
 0x225   : > { %4563 = vmatmul.mubr.msk.bf16.gmra.mrb[12].mxu1 %vm1342_vm0, %v6143_v4  ;;  %4530 = vmatprep.mubr.msk.bf16.mxu0 %vm1342_vm0, %v4197_v7  ;;  %v6172_v7 = vpack.c.bf16 %v1408_v57, %v2051_v12  ;;  %v1412_v12 = vld [vmem:[#allocation2 + $0xd0] sm:$0xff]  ;;  %v4244_v29 = vpack.c.bf16 %v2740_v28, %v6190_v42 }
 0x226   : > { %4570 = vmatprep.mubr.msk.bf16.mxu1 %vm1342_vm0, %v4213_v8  ;;  %v4216_v8 = vpack.c.bf16 %v6167_v23, %v1408_v57 }
 0x22c   : > { %4531 = vmatmul.mubr.msk.bf16.vlgmr.msra.gmra.mrb[16].mxu0 %vm1342_vm0, %v6153_v14 }
 0x22d   : > { %4571 = vmatmul.mubr.msk.bf16.vlgmr.msra.gmra.mrb[0].mxu1 %vm1342_vm0, %v4214_v15  ;;  %4534 = vmatprep.mubr.msk.bf16.mxu0 %vm1342_vm0, %v6155_v17  ;;  %v2059_v15 = vld [vmem:[#allocation2 + $0x100] sm:$0xff] }
 0x22e   : > { %4574 = vmatprep.mubr.msk.bf16.mxu1 %vm1342_vm0, %v4215_v18  ;;  %4587 = vmatpush3.bf16.msra.mxu1 %v6018_v54  ;;  %v2057_v54 = vld [vmem:[#allocation2 + $0xe0] sm:$0xff]  ;;  %v6180_v18 = vpack.c.bf16 %v1412_v12, %v2055_v55  ;;  %v4219_v25 = vpack.c.bf16 %v2059_v15, %v1414_v13 }
 0x22f   : > { %4588 = vmatprep.subr.bf16.mxu1 %v5040_v49  ;;  %v4218_v57 = vpack.c.bf16 %v2057_v54, %v1412_v12  ;;  %v6339_v12 = vld [vmem:[%s6656_s20] ss:$0 sm:$0xff]  ;;  %s6660_s20 = sld [smem:[#allocation38_spill]] }
 0x232   : > { %4589 = vmatpush3.bf16.msra.mxu1 %v5040_v49  ;;  %v6182_v49 = vpack.c.bf16 %v1414_v13, %v2057_v54  ;;  %v4222_v54 = vpack.c.bf16 %v6021_v56, %v5977_v31  ;;  %v5042_v13 = vld [vmem:[%s6650_s11 + $0x58] sm:$0xff]   ;;  %v4225_v56 = vpack.c.bf16 %v6086_v51, %v6074_v19  ;;  %v5044_v19 = vld [vmem:[%s6650_s11 + $0x68] sm:$0xff]  }
 0x233   : > { %4606 = vmatprep.subr.bf16.mxu1 %v5041_v24  ;;  %v5048_v51 = vld [vmem:[%s6650_s11 + $0x88] sm:$0xff]  }
 0x234   : > { %4535 = vmatmul.mubr.msk.bf16.gmra.mrb[20].mxu0 %vm1342_vm0, %v6172_v7 }
 0x235   : > { %4575 = vmatmul.mubr.msk.bf16.gmra.mrb[4].mxu1 %vm1342_vm0, %v4216_v8  ;;  %4538 = vmatprep.mubr.msk.bf16.mxu0 %vm1342_vm0, %v4201_v10  ;;  %v1416_v8 = vld [vmem:[#allocation2 + $0x110] sm:$0xff] }
 0x236   : > { %4578 = vmatprep.mubr.msk.bf16.mxu1 %vm1342_vm0, %v4217_v11  ;;  %v6192_v10 = vpack.c.bf16 %v1416_v8, %v2059_v15  ;;  %v4220_v55 = vpack.c.bf16 %v6190_v42, %v1416_v8  ;;  %v4221_v11 = vpack.c.bf16 %v5975_v30, %v5962_v20  ;;  %v4223_v15 = vpack.c.bf16 %v6040_v0, %v6023_v47  ;;  %v5043_v20 = vld [vmem:[%s6650_s11 + $0x60] sm:$0xff]  }
 0x237   : > { %v6213_v30 = vld [vmem:[#allocation2 + $0x81] sm:$0xff]  ;;  %v4226_v47 = vpack.c.bf16 %v6111_v43, %v6088_v34  ;;  %v4227_v0 = vpack.c.bf16 %v6127_v58, %v6113_v44  ;;  %v2958_v34 = vld [vmem:[#allocation2 + $0x91] sm:$0xff] }
 0x238   : > { %v4224_v31 = vpack.c.bf16 %v6213_v30, %v6036_v61  ;;  %v4248_v35 = vpack.c.bf16 %v2958_v34, %v6213_v30 }
 0x23c   : > { %4539 = vmatmul.mubr.msk.bf16.gmra.mrb[24].mxu0 %vm1342_vm0, %v6180_v18 }
 0x23d   : > { %4579 = vmatmul.mubr.msk.bf16.gmra.mrb[8].mxu1 %vm1342_vm0, %v4218_v57  ;;  %4542 = vmatprep.mubr.msk.bf16.mxu0 %vm1342_vm0, %v6182_v49 }
 0x23e   : > { %4582 = vmatprep.mubr.msk.bf16.mxu1 %vm1342_vm0, %v4219_v25 }
 0x244   : > { %4543 = vmatmul.mubr.msk.bf16.gmra.mrb[28].mxu0 %vm1342_vm0, %v6192_v10 }
 0x245   : > { %4583 = vmatmul.mubr.msk.bf16.gmra.mrb[12].mxu1 %vm1342_vm0, %v4220_v55 }
 0x246   : > { %4590 = vmatprep.mubr.msk.bf16.mxu1 %vm1342_vm0, %v4221_v11 }
 0x24d   : > { %4591 = vmatmul.mubr.msk.bf16.vlgmr.msra.gmra.mrb[0].mxu1 %vm1342_vm0, %v4222_v54 }
 0x24e   : > { %4594 = vmatprep.mubr.msk.bf16.mxu1 %vm1342_vm0, %v4223_v15  ;;  %4607 = vmatpush3.bf16.msra.mxu1 %v5041_v24  ;;  %v2287_v24 = vld [vmem:[#allocation2 + $0x121] sm:$0xff] }
 0x24f   : > { %4608 = vmatprep.subr.bf16.mxu1 %v5042_v13  ;;  %v4228_v61 = vpack.c.bf16 %v2287_v24, %v6125_v53 }
 0x252   : > { %4609 = vmatpush3.bf16.msra.mxu1 %v5042_v13 }
 0x253   : > { %4626 = vmatprep.subr.bf16.mxu1 %v5043_v20 }
 0x255   : > { %4595 = vmatmul.mubr.msk.bf16.gmra.mrb[4].mxu1 %vm1342_vm0, %v4224_v31 }
 0x256   : > { %4598 = vmatprep.mubr.msk.bf16.mxu1 %vm1342_vm0, %v4225_v56 }
 0x25d   : > { %4599 = vmatmul.mubr.msk.bf16.gmra.mrb[8].mxu1 %vm1342_vm0, %v4226_v47 }
 0x25e   : > { %4602 = vmatprep.mubr.msk.bf16.mxu1 %vm1342_vm0, %v4227_v0 }
 0x265   : > { %4603 = vmatmul.mubr.msk.bf16.gmra.mrb[12].mxu1 %vm1342_vm0, %v4228_v61 }
 0x266   : > { %4610 = vmatprep.mubr.msk.bf16.mxu1 %vm1342_vm0, %v4229_v50  ;;  %v4232_v50 = vpack.c.bf16 %v2505_v32, %v6044_v2  ;;  %v4240_v2 = vpack.c.bf16 %v2732_v1, %v6167_v23 }
 0x26d   : > { %4611 = vmatmul.mubr.msk.bf16.vlgmr.msra.gmra.mrb[0].mxu1 %vm1342_vm0, %v4230_v33  ;;  %v5046_v33 = vld [vmem:[%s6650_s11 + $0x78] sm:$0xff]  }
 0x26e   : > { %4614 = vmatprep.mubr.msk.bf16.mxu1 %vm1342_vm0, %v4231_v16  ;;  %4627 = vmatpush3.bf16.msra.mxu1 %v5043_v20  ;;  %v5049_v16 = vld [vmem:[%s6653_s14] sm:$0xff]  }
 0x26f   : > { %4628 = vmatprep.subr.bf16.mxu1 %v5044_v19  ;;  %4686 = vmatprep.subr.bf16.mxu0 %v5049_v16 }
 0x270   : > { %4687 = vmatpush3.bf16.msra.mxu0 %v5049_v16 }
 0x271   : > { %4688 = vmatprep.subr.bf16.mxu0 %v5050_v22 }
 0x272   : > { %4629 = vmatpush3.bf16.msra.mxu1 %v5044_v19 }
 0x273   : > { %4646 = vmatprep.subr.bf16.mxu1 %v5045_v21 }
 0x274   : > { %4689 = vmatpush3.bf16.msra.mxu0 %v5050_v22 }
 0x275   : > { %4615 = vmatmul.mubr.msk.bf16.gmra.mrb[4].mxu1 %vm1342_vm0, %v4232_v50 }
 0x276   : > { %4618 = vmatprep.mubr.msk.bf16.mxu1 %vm1342_vm0, %v4233_v41 }
 0x27d   : > { %4619 = vmatmul.mubr.msk.bf16.gmra.mrb[8].mxu1 %vm1342_vm0, %v4234_v38 }
 0x27e   : > { %4622 = vmatprep.mubr.msk.bf16.mxu1 %vm1342_vm0, %v4235_v9 }
 0x285   : > { %4623 = vmatmul.mubr.msk.bf16.gmra.mrb[12].mxu1 %vm1342_vm0, %v4236_v27 }
 0x286   : > { %4630 = vmatprep.mubr.msk.bf16.mxu1 %vm1342_vm0, %v6153_v14 }
 0x28d   : > { %4631 = vmatmul.mubr.msk.bf16.vlgmr.msra.gmra.mrb[0].mxu1 %vm1342_vm0, %v6155_v17  ;;  %v6334_v17 = vld [vmem:[%s6655_s13] ss:$0 sm:$0xff]  ;;  %s4177_s13 = sshll.u32 %s3718_s17, 7 }
 0x28e   : > { %4634 = vmatprep.mubr.msk.bf16.mxu1 %vm1342_vm0, %v6172_v7  ;;  %4647 = vmatpush3.bf16.msra.mxu1 %v5045_v21  ;;  %s6469_s24 = scalar_lea.hbm %s6660_s20, %s4177_s13 }
 0x28f   : > { %4648 = vmatprep.subr.bf16.mxu1 %v5046_v33 }
 0x292   : > { %4649 = vmatpush3.bf16.msra.mxu1 %v5046_v33 }
 0x293   : > { %4666 = vmatprep.subr.bf16.mxu1 %v5047_v48 }
 0x295   : > { %4635 = vmatmul.mubr.msk.bf16.gmra.mrb[4].mxu1 %vm1342_vm0, %v4240_v2 }
 0x296   : > { %4638 = vmatprep.mubr.msk.bf16.mxu1 %vm1342_vm0, %v6180_v18 }
 0x29d   : > { %4639 = vmatmul.mubr.msk.bf16.gmra.mrb[8].mxu1 %vm1342_vm0, %v6182_v49 }
 0x29e   : > { %4642 = vmatprep.mubr.msk.bf16.mxu1 %vm1342_vm0, %v6192_v10 }
 0x2a5   : > { %4643 = vmatmul.mubr.msk.bf16.gmra.mrb[12].mxu1 %vm1342_vm0, %v4244_v29 }
 0x2a6   : > { %4650 = vmatprep.mubr.msk.bf16.mxu1 %vm1342_vm0, %v5989_v36  ;;  %v2966_v36 = vld [vmem:[#allocation2 + $0x131] sm:$0xff] }
 0x2ad   : > { %4651 = vmatmul.mubr.msk.bf16.vlgmr.msra.gmra.mrb[0].mxu1 %vm1342_vm0, %v6030_v59  ;;  %v4252_v59 = vpack.c.bf16 %v2966_v36, %v2287_v24 }
 0x2ae   : > { %4654 = vmatprep.mubr.msk.bf16.mxu1 %vm1342_vm0, %v6054_v5  ;;  %4667 = vmatpush3.bf16.msra.mxu1 %v5047_v48  ;;  %v3184_v5 = vld [vmem:[#allocation2 + $0x92] sm:$0xff] }
 0x2af   : > { %4668 = vmatprep.subr.bf16.mxu1 %v5048_v51  ;;  %v4256_v38 = vpack.c.bf16 %v3184_v5, %v2505_v32 }
 0x2b2   : > { %4669 = vmatpush3.bf16.msra.mxu1 %v5048_v51 }
 0x2b5   : > { %4655 = vmatmul.mubr.msk.bf16.gmra.mrb[4].mxu1 %vm1342_vm0, %v4248_v35 }
 0x2b6   : > { %4658 = vmatprep.mubr.msk.bf16.mxu1 %vm1342_vm0, %v6099_v39 }
 0x2bd   : > { %4659 = vmatmul.mubr.msk.bf16.gmra.mrb[8].mxu1 %vm1342_vm0, %v6119_v46 }
 0x2be   : > { %4662 = vmatprep.mubr.msk.bf16.mxu1 %vm1342_vm0, %v6139_v3 }
 0x2c5   : > { %4663 = vmatmul.mubr.msk.bf16.gmra.mrb[12].mxu1 %vm1342_vm0, %v4252_v59 }
 0x2c6   : > { %4670 = vmatprep.mubr.msk.bf16.mxu1 %vm1342_vm0, %v5993_v37  ;;  %v3192_v37 = vld [vmem:[#allocation2 + $0x132] sm:$0xff] }
 0x2c7   : > { %v4260_v39 = vpack.c.bf16 %v3192_v37, %v2513_v26 }
 0x2cd   : > { %4671 = vmatmul.mubr.msk.bf16.vlgmr.msra.gmra.mrb[0].mxu1 %vm1342_vm0, %v6034_v60 }
 0x2ce   : > { %4674 = vmatprep.mubr.msk.bf16.mxu1 %vm1342_vm0, %v6058_v6 }
 0x2d5   : > { %4675 = vmatmul.mubr.msk.bf16.gmra.mrb[4].mxu1 %vm1342_vm0, %v4256_v38 }
 0x2d6   : > { %4678 = vmatprep.mubr.msk.bf16.mxu1 %vm1342_vm0, %v6103_v40 }
 0x2dd   : > { %4679 = vmatmul.mubr.msk.bf16.gmra.mrb[8].mxu1 %vm1342_vm0, %v6123_v52 }
 0x2de   : > { %4682 = vmatprep.mubr.msk.bf16.mxu1 %vm1342_vm0, %v6143_v4 }
 0x2e5   : > { %4683 = vmatmul.mubr.msk.bf16.gmra.mrb[12].mxu1 %vm1342_vm0, %v4260_v39 }
 0x2ff   : > { %v4532_v60 = vpop.f32.mrb[16].mxu0 }
 0x300   : > { %v1757_v41 = vpop.f32.mrb[17].mxu0 }
 0x301   : > { %v4533_v6 = vpop.f32.mrb[18].mxu0 }
 0x302   : > { %v1760_v43 = vpop.f32.mrb[19].mxu0 }
 0x307   : > { %v4536_v44 = vpop.f32.mrb[20].mxu0 }
 0x308   : > { %v1773_v45 = vpop.f32.mrb[21].mxu0 }
 0x309   : > { %v4537_v46 = vpop.f32.mrb[22].mxu0 }
 0x30a   : > { %v1776_v53 = vpop.f32.mrb[23].mxu0 }
 0x30f   : > { %v4540_v58 = vpop.f32.mrb[24].mxu0 }
 0x310   : > { %v1789_v40 = vpop.f32.mrb[25].mxu0 }
 0x311   : > { %v4541_v62 = vpop.f32.mrb[26].mxu0 }
 0x312   : > { %v1792_v63 = vpop.f32.mrb[27].mxu0 }
 0x317   : > { %v6323_v52 = vpop.f32.mrb[28].mxu0 }
 0x318   : > { %v6325_v3 = vpop.f32.mrb[29].mxu0 }
 0x319   : > { %v6327_v4 = vpop.f32.mrb[30].mxu0 }
 0x31a   : > { %v6329_v9 = vpop.f32.mrb[31].mxu0 }
 0x3a0   : > { %v4672_v14 = vpop.f32.mrb[0].mxu1 }
 0x3a1   : > { %v4706_v23 = vadd.f32 %v4672_v14, %v4532_v60  ;;  %v3324_v7 = vpop.f32.mrb[1].mxu1 }
 0x3a2   : > { %v4707_v18 = vadd.f32 %v3324_v7, %v1757_v41  ;;  %v4673_v57 = vpop.f32.mrb[2].mxu1 }
 0x3a3   : > { %v3412_v49 = vmul.f32 %v4706_v23, %v6334_v17  ;;  %v4708_v25 = vadd.f32 %v4673_v57, %v4533_v6  ;;  %v3327_v42 = vpop.f32.mrb[3].mxu1 }
 0x3a4   : > { %v3410_v8 = vmul.f32 %v4707_v18, %v6334_v17  ;;  %v4709_v10 = vadd.f32 %v3327_v42, %v1760_v43 }
 0x3a5   : > { %v3435_v55 = vadd.f32 %v6339_v12, %v3412_v49  ;;  %v3413_v11 = vmul.f32 %v4708_v25, %v6334_v17 }
 0x3a6   : > { %v3433_v54 = vadd.f32 %v6339_v12, %v3410_v8  ;;  %v3411_v13 = vmul.f32 %v4709_v10, %v6334_v17 }
 0x3a7   : > { %v3436_v15 = vadd.f32 %v6339_v12, %v3413_v11  ;;  %v3451_v31 = vmax.f32 %v3435_v55, 0.0 }
 0x3a8   : > { %v3434_v20 = vadd.f32 %v6339_v12, %v3411_v13  ;;  %v4676_v30 = vpop.f32.mrb[4].mxu1  ;;  %v3449_v24 = vmax.f32 %v3433_v54, 0.0 }
 0x3a9   : > { %v3452_v56 = vmax.f32 %v3436_v15, 0.0  ;;  %v4710_v47 = vadd.f32 %v4676_v30, %v4536_v44  ;;  %v3340_v0 = vpop.f32.mrb[5].mxu1 }
 0x3aa   : > { %v3450_v61 = vmax.f32 %v3434_v20, 0.0  ;;  %v4711_v19 = vadd.f32 %v3340_v0, %v1773_v45  ;;  %v4677_v21 = vpop.f32.mrb[6].mxu1 }
 0x3ab   : > { %v3466_v32 = vpack.c.bf16 %v3452_v56, %v3451_v31  ;;  %v3416_v50 = vmul.f32 %v4710_v47, %v6334_v17  ;;  %v4712_v26 = vadd.f32 %v4677_v21, %v4537_v46  ;;  %v3343_v27 = vpop.f32.mrb[7].mxu1 }
 0x3ac   : > { %v3465_v33 = vpack.c.bf16 %v3450_v61, %v3449_v24  ;;  %v3414_v48 = vmul.f32 %v4711_v19, %v6334_v17  ;;  %v4713_v1 = vadd.f32 %v3343_v27, %v1776_v53 }
 0x3ad   : > { %v3439_v2 = vadd.f32 %v6339_v12, %v3416_v50  ;;  %v3417_v16 = vmul.f32 %v4712_v26, %v6334_v17 }
 0x3ae   : > { %v3437_v22 = vadd.f32 %v6339_v12, %v3414_v48  ;;  %v3415_v28 = vmul.f32 %v4713_v1, %v6334_v17  ;;  %4690 = vmatprep.mubr.msk.bf16.mxu0 %vm1342_vm0, %v3465_v33 }
 0x3af   : > { %v3440_v29 = vadd.f32 %v6339_v12, %v3417_v16  ;;  %4691 = vmatmul.mubr.msk.bf16.vlgmr.msra.gmra.mrb[32].mxu0 %vm1342_vm0, %v3466_v32  ;;  %v3455_v35 = vmax.f32 %v3439_v2, 0.0 }
 0x3b0   : > { %v3438_v51 = vadd.f32 %v6339_v12, %v3415_v28  ;;  %v4680_v34 = vpop.f32.mrb[8].mxu1  ;;  %v3453_v38 = vmax.f32 %v3437_v22, 0.0 }
 0x3b1   : > { %v3456_v36 = vmax.f32 %v3440_v29, 0.0  ;;  %v4714_v59 = vadd.f32 %v4680_v34, %v4540_v58  ;;  %v3356_v5 = vpop.f32.mrb[9].mxu1  ;;  %v5051_v29 = vld [vmem:[%s5734_s19 + $0x10] sm:$0xff] }
 0x3b2   : > { %v3454_v37 = vmax.f32 %v3438_v51, 0.0  ;;  %v4715_v39 = vadd.f32 %v3356_v5, %v1789_v40  ;;  %v4681_v60 = vpop.f32.mrb[10].mxu1 }
 0x3b3   : > { %v3468_v41 = vpack.c.bf16 %v3456_v36, %v3455_v35  ;;  %v3420_v6 = vmul.f32 %v4714_v59, %v6334_v17  ;;  %v4716_v43 = vadd.f32 %v4681_v60, %v4541_v62  ;;  %v3359_v44 = vpop.f32.mrb[11].mxu1  ;;  %v5052_v35 = vld [vmem:[%s5734_s19] sm:$0xff]  ;;  %v5054_v60 = vld [vmem:[%s5734_s19 + $0x8] sm:$0xff] }
 0x3b4   : > { %v3467_v45 = vpack.c.bf16 %v3454_v37, %v3453_v38  ;;  %v3418_v46 = vmul.f32 %v4715_v39, %v6334_v17  ;;  %v4717_v53 = vadd.f32 %v3359_v44, %v1792_v63  ;;  %v5053_v38 = vld [vmem:[%s5734_s19 + $0x18] sm:$0xff] }
 0x3b5   : > { %v3443_v14 = vadd.f32 %v6339_v12, %v3420_v6  ;;  %v3421_v23 = vmul.f32 %v4716_v43, %v6334_v17 }
 0x3b6   : > { %v3441_v58 = vadd.f32 %v6339_v12, %v3418_v46  ;;  %v3419_v7 = vmul.f32 %v4717_v53, %v6334_v17  ;;  %4694 = vmatprep.mubr.msk.bf16.mxu0 %vm1342_vm0, %v3467_v45 }
 0x3b7   : > { %v3444_v40 = vadd.f32 %v6339_v12, %v3421_v23  ;;  %4695 = vmatmul.mubr.msk.bf16.gmra.mrb[36].mxu0 %vm1342_vm0, %v3468_v41  ;;  %v3459_v57 = vmax.f32 %v3443_v14, 0.0 }
 0x3b8   : > { %v3442_v62 = vadd.f32 %v6339_v12, %v3419_v7  ;;  %v4684_v18 = vpop.f32.mrb[12].mxu1  ;;  %v3457_v42 = vmax.f32 %v3441_v58, 0.0 }
 0x3b9   : > { %v3460_v49 = vmax.f32 %v3444_v40, 0.0  ;;  %v4718_v63 = vadd.f32 %v4684_v18, %v6323_v52  ;;  %v3372_v25 = vpop.f32.mrb[13].mxu1  ;;  %v5055_v18 = vld [vmem:[%s5734_s19 + $0x30] sm:$0xff] }
 0x3ba   : > { %v3458_v8 = vmax.f32 %v3442_v62, 0.0  ;;  %v4719_v10 = vadd.f32 %v3372_v25, %v6325_v3  ;;  %v4685_v55 = vpop.f32.mrb[14].mxu1 }
 0x3bb   : > { %v3470_v11 = vpack.c.bf16 %v3460_v49, %v3459_v57  ;;  %v3424_v54 = vmul.f32 %v4718_v63, %v6334_v17  ;;  %v4720_v13 = vadd.f32 %v4685_v55, %v6327_v4  ;;  %v3375_v15 = vpop.f32.mrb[15].mxu1  ;;  %v5056_v63 = vld [vmem:[%s5734_s19 + $0x20] sm:$0xff] }
 0x3bc   : > { %v3469_v20 = vpack.c.bf16 %v3458_v8, %v3457_v42  ;;  %v3422_v30 = vmul.f32 %v4719_v10, %v6334_v17  ;;  %v4721_v31 = vadd.f32 %v3375_v15, %v6329_v9  ;;  %v5057_v10 = vld [vmem:[%s5734_s19 + $0x38] sm:$0xff] }
 0x3bd   : > { %v3447_v56 = vadd.f32 %v6339_v12, %v3424_v54  ;;  %v3425_v52 = vmul.f32 %v4720_v13, %v6334_v17  ;;  %v5058_v54 = vld [vmem:[%s5734_s19 + $0x28] sm:$0xff] }
 0x3be   : > { %v3445_v47 = vadd.f32 %v6339_v12, %v3422_v30  ;;  %v3423_v3 = vmul.f32 %v4721_v31, %v6334_v17  ;;  %4698 = vmatprep.mubr.msk.bf16.mxu0 %vm1342_vm0, %v3469_v20  ;;  %v6388_v17 = vld [vmem:[%s6657_s2] ss:$0 sm:$0xff]  ;;  %s5157_s2 = scalar_lea.vmem %s6463_s4, 2048 }
 0x3bf   : > { %v3448_v0 = vadd.f32 %v6339_v12, %v3425_v52  ;;  %4699 = vmatmul.mubr.msk.bf16.gmra.mrb[40].mxu0 %vm1342_vm0, %v3470_v11  ;;  %v3463_v24 = vmax.f32 %v3447_v56, 0.0  ;;  %p5158_p4 = scmp.ne.s32.totalorder %s6463_s4, %s5157_s2 }
 0x3c0   : > { %v3446_v4 = vadd.f32 %v6339_v12, %v3423_v3  ;;  %v3461_v19 = vmax.f32 %v3445_v47, 0.0  ;;  %v6393_v12 = vld [vmem:[%s6658_s5] ss:$0 sm:$0xff] }
 0x3c1   : > { %v3464_v61 = vmax.f32 %v3448_v0, 0.0  ;;  %p5159_p12 = pnand %p5158_p4, %p6661_p0 }
 0x3c2   : > { %v3462_v9 = vmax.f32 %v3446_v4, 0.0 }
 0x3c3   : > { %v3472_v21 = vpack.c.bf16 %v3464_v61, %v3463_v24  ;;  %p5160_p11 = pneg %p5159_p12 }
 0x3c4   : > { %v3471_v32 = vpack.c.bf16 %v3462_v9, %v3461_v19  ;;  %v5059_v19 = vld [vmem:[%s5734_s19 + $0x50] sm:$0xff] }
 0x3c6   : > { %4702 = vmatprep.mubr.msk.bf16.mxu0 %vm1342_vm0, %v3471_v32  ;;  %v5060_v32 = vld [vmem:[%s5734_s19 + $0x40] sm:$0xff] }
 0x3c7   : > { %4703 = vmatmul.mubr.msk.bf16.gmra.mrb[44].mxu0 %vm1342_vm0, %v3472_v21 }
 0x482   : > { %v4692_v50 = vpop.f32.mrb[32].mxu0 }
 0x483   : > { %v3619_v26 = vmul.f32 %v4692_v50, %v6388_v17  ;;  %v3547_v27 = vpop.f32.mrb[33].mxu0 }
 0x484   : > { %v3617_v33 = vmul.f32 %v6388_v17, %v3547_v27  ;;  %v4693_v48 = vpop.f32.mrb[34].mxu0 }
 0x485   : > { %v3642_v1 = vadd.f32 %v6393_v12, %v3619_v26  ;;  %v3620_v2 = vmul.f32 %v4693_v48, %v6388_v17  ;;  %v3550_v16 = vpop.f32.mrb[35].mxu0 }
 0x486   : > { %v3640_v22 = vadd.f32 %v6393_v12, %v3617_v33  ;;  %v3618_v28 = vmul.f32 %v6388_v17, %v3550_v16  ;;  %v5061_v33 = vld [vmem:[%s5734_s19 + $0x58] sm:$0xff] }
 0x487   : > { %v3658_v51 = vadd.f32 %v5051_v29, %v3642_v1  ;;  %v3643_v34 = vadd.f32 %v6393_v12, %v3620_v2  ;;  %v5062_v2 = vld [vmem:[%s5734_s19 + $0x48] sm:$0xff] }
 0x488   : > { %v3656_v36 = vadd.f32 %v5052_v35, %v3640_v22  ;;  %v3641_v59 = vadd.f32 %v6393_v12, %v3618_v28 }
 0x489   : > { %v3674_v5 = vmax.f32 %v3658_v51, 0.0  ;;  %v3659_v37 = vadd.f32 %v5053_v38, %v3643_v34 }
 0x48a   : > { %v3672_v39 = vmax.f32 %v3656_v36, 0.0  ;;  %v3657_v41 = vadd.f32 %v5054_v60, %v3641_v59  ;;  %v4696_v6 = vpop.f32.mrb[36].mxu0  ;;  %v5063_v60 = vld [vmem:[%s5734_s19 + $0x70] sm:$0xff] }
 0x48b   : > { %3690 = vst [vmem:[%s6409_s10 + $0x10] sm:$0xff] %v3674_v5  ;;  %v3675_v43 = vmax.f32 %v3659_v37, 0.0  ;;  %v3623_v44 = vmul.f32 %v4696_v6, %v6388_v17  ;;  %v3563_v45 = vpop.f32.mrb[37].mxu0 }
 0x48c   : > { %3688 = vst [vmem:[%s6409_s10] sm:$0xff] %v3672_v39  ;;  %v3673_v46 = vmax.f32 %v3657_v41, 0.0  ;;  %v3621_v53 = vmul.f32 %v6388_v17, %v3563_v45  ;;  %v4697_v14 = vpop.f32.mrb[38].mxu0 }
 0x48d   : > { %3691 = vst [vmem:[%s6409_s10 + $0x18] sm:$0xff] %v3675_v43  ;;  %v3646_v23 = vadd.f32 %v6393_v12, %v3623_v44  ;;  %v3624_v58 = vmul.f32 %v4697_v14, %v6388_v17  ;;  %v3566_v7 = vpop.f32.mrb[39].mxu0  ;;  %v5064_v43 = vld [vmem:[%s5734_s19 + $0x60] sm:$0xff] }
 0x48e   : > { %3689 = vst [vmem:[%s6409_s10 + $0x8] sm:$0xff] %v3673_v46  ;;  %v3644_v40 = vadd.f32 %v6393_v12, %v3621_v53  ;;  %v3622_v62 = vmul.f32 %v6388_v17, %v3566_v7  ;;  %v5065_v53 = vld [vmem:[%s5734_s19 + $0x78] sm:$0xff] }
 0x48f   : > { %v3662_v57 = vadd.f32 %v5055_v18, %v3646_v23  ;;  %v3647_v49 = vadd.f32 %v6393_v12, %v3624_v58  ;;  %v5066_v23 = vld [vmem:[%s5734_s19 + $0x68] sm:$0xff]  ;;  %s5319_s19 = smov [#allocation9]  }
 0x490   : > { %v3660_v25 = vadd.f32 %v5056_v63, %v3644_v40  ;;  %v3645_v42 = vadd.f32 %v6393_v12, %v3622_v62  ;;  %s5161_s14 = sshll.u32 %s5319_s19, 4  ;;  %s5162_s14 = int_to_ptr.vmem [resolvable:$false] %s5161_s14 }
 0x491   : > { %v3678_v8 = vmax.f32 %v3662_v57, 0.0  ;;  %v3663_v55 = vadd.f32 %v5057_v10, %v3647_v49  ;;  %s5163_s29 = scalar_lea.vmem %s5162_s14, 4096  ;;  %p5164_p2 = scmp.lt.s32.totalorder %s6463_s4, %s5162_s14 }
 0x492   : > { %v3676_v11 = vmax.f32 %v3660_v25, 0.0  ;;  %v3661_v13 = vadd.f32 %v5058_v54, %v3645_v42  ;;  %v4700_v15 = vpop.f32.mrb[40].mxu0  ;;  %p5165_p1 = scmp.lt.s32.totalorder %s5163_s29, %s5157_s2 }
 0x493   : > { %3694 = vst [vmem:[%s6409_s10 + $0x30] sm:$0xff] %v3678_v8  ;;  %v3679_v20 = vmax.f32 %v3663_v55, 0.0  ;;  %v3627_v30 = vmul.f32 %v4700_v15, %v6388_v17  ;;  %v3579_v31 = vpop.f32.mrb[41].mxu0 }
 0x494   : > { %3692 = vst [vmem:[%s6409_s10 + $0x20] sm:$0xff] %v3676_v11  ;;  %v3677_v56 = vmax.f32 %v3661_v13, 0.0  ;;  %v3625_v52 = vmul.f32 %v6388_v17, %v3579_v31  ;;  %v4701_v47 = vpop.f32.mrb[42].mxu0  ;;  %p5166_p5 = por %p5165_p1, %p5164_p2 }
 0x495   : > { %3695 = vst [vmem:[%s6409_s10 + $0x38] sm:$0xff] %v3679_v20  ;;  %v3650_v3 = vadd.f32 %v6393_v12, %v3627_v30  ;;  %v3628_v0 = vmul.f32 %v4701_v47, %v6388_v17  ;;  %v3582_v4 = vpop.f32.mrb[43].mxu0 }
 0x496   : > { %3693 = vst [vmem:[%s6409_s10 + $0x28] sm:$0xff] %v3677_v56  ;;  %v3648_v24 = vadd.f32 %v6393_v12, %v3625_v52  ;;  %v3626_v61 = vmul.f32 %v6388_v17, %v3582_v4  ;;  %p5167_p8 = pnand %p5166_p5, %p5160_p11 }
 0x497   : > { %v3666_v9 = vadd.f32 %v5059_v19, %v3650_v3  ;;  %v3651_v21 = vadd.f32 %v6393_v12, %v3628_v0 }
 0x498   : > { %v3664_v50 = vadd.f32 %v5060_v32, %v3648_v24  ;;  %v3649_v26 = vadd.f32 %v6393_v12, %v3626_v61 }
 0x499   : > { %v3682_v27 = vmax.f32 %v3666_v9, 0.0  ;;  %v3667_v48 = vadd.f32 %v5061_v33, %v3651_v21 }
 0x49a   : > { %v3680_v1 = vmax.f32 %v3664_v50, 0.0  ;;  %v3665_v16 = vadd.f32 %v5062_v2, %v3649_v26  ;;  %v4704_v22 = vpop.f32.mrb[44].mxu0 }
 0x49b   : > { %3698 = vst [vmem:[%s6409_s10 + $0x50] sm:$0xff] %v3682_v27  ;;  %v3683_v28 = vmax.f32 %v3667_v48, 0.0  ;;  %v3631_v29 = vmul.f32 %v4704_v22, %v6388_v17  ;;  %v3595_v51 = vpop.f32.mrb[45].mxu0 }
 0x49c   : > { %3696 = vst [vmem:[%s6409_s10 + $0x40] sm:$0xff] %v3680_v1  ;;  %v3681_v34 = vmax.f32 %v3665_v16, 0.0  ;;  %v3629_v35 = vmul.f32 %v6388_v17, %v3595_v51  ;;  %v4705_v36 = vpop.f32.mrb[46].mxu0 }
 0x49d   : > { %3699 = vst [vmem:[%s6409_s10 + $0x58] sm:$0xff] %v3683_v28  ;;  %v3654_v59 = vadd.f32 %v6393_v12, %v3631_v29  ;;  %v3632_v5 = vmul.f32 %v4705_v36, %v6388_v17  ;;  %v3598_v38 = vpop.f32.mrb[47].mxu0 }
 0x49e   : > { %3697 = vst [vmem:[%s6409_s10 + $0x48] sm:$0xff] %v3681_v34  ;;  %v3652_v37 = vadd.f32 %v6393_v12, %v3629_v35  ;;  %v3630_v39 = vmul.f32 %v6388_v17, %v3598_v38 }
 0x49f   : > { %v3670_v41 = vadd.f32 %v5063_v60, %v3654_v59  ;;  %v3655_v6 = vadd.f32 %v6393_v12, %v3632_v5 }
 0x4a0   : > { %v3668_v44 = vadd.f32 %v5064_v43, %v3652_v37  ;;  %v3653_v45 = vadd.f32 %v6393_v12, %v3630_v39 }
 0x4a1   : > { %v3686_v46 = vmax.f32 %v3670_v41, 0.0  ;;  %v3671_v14 = vadd.f32 %v5065_v53, %v3655_v6 }
 0x4a2   : > { %v3684_v17 = vmax.f32 %v3668_v44, 0.0  ;;  %v3669_v58 = vadd.f32 %v5066_v23, %v3653_v45 }
 0x4a3   : > { %3702 = vst [vmem:[%s6409_s10 + $0x70] sm:$0xff] %v3686_v46  ;;  %v3687_v7 = vmax.f32 %v3671_v14, 0.0 }
 0x4a4   : > { %3700 = vst [vmem:[%s6409_s10 + $0x60] sm:$0xff] %v3684_v17  ;;  %v3685_v12 = vmax.f32 %v3669_v58, 0.0 }
 0x4a5   : > { %3703 = vst [vmem:[%s6409_s10 + $0x78] sm:$0xff] %v3687_v7 }
 0x4a6   : > { %3701 = vst [vmem:[%s6409_s10 + $0x68] sm:$0xff] %v3685_v12 }
 0x4a7   : > { %5170 = shalt.err (!%p5167_p8)
}
 0x4a8   : > { %s5171_s5 = scalar_lea.hbm %s6469_s24, 2048  ;;  %s5175_s6 = scalar_lea.hbm %s6660_s20, 8192 }
 0x4a9   : > { %p5172_p13 = scmp.ne.s32.totalorder %s6469_s24, %s5171_s5  ;;  %p5176_p9 = scmp.lt.u32.totalorder %s6469_s24, %s6660_s20 }
 0x4aa   : > { %p5177_p7 = scmp.lt.u32.totalorder %s5175_s6, %s5171_s5  ;;  %p5179_p4 = scmp.lt.u32.totalorder %s5171_s5, %s6469_s24 }
 0x4ab   : > { %p5173_p10 = pnand %p5172_p13, %p6661_p0 }
 0x4ac   : > { %p5178_p6 = por %p5177_p7, %p5176_p9 }
 0x4ad   : > { %p5174_p3 = pneg %p5173_p10 }
 0x4ae   : > { %p5180_p12 = por %p5179_p4, %p5178_p6 }
 0x4b0   : > { %p5181_p11 = pnand %p5180_p12, %p5174_p3 }
 0x4b2   : > { %5184 = shalt.err (!%p5181_p11)
}
 0x4b3   : > { %s5320_s13 = smov 128   ;;  %s5321_s15 = smov 8  }
 0x4b4   : > { %4872 = dma.vmem_to_hbm [thread:$0]  (%p6661_p0), %s6463_s4, 2048, %s6469_s24, %s3705_s30, %s5320_s13, %s5320_s13, %s5321_s15  }
 0x4b5 PF: > { %p4889_p2 = scmp.ge.s32.totalorder %s5311_s16, 2  ;;  %s3736_s21 = sand.u32 1, %s5283_s27  }
 0x4b6   : > { %p6662_p1 = scmp.ne.s32.totalorder %s6626_s18, 0  ;;  %s3737_s2 = scalar_lea.sflag [#allocation5], %s3736_s21 }
 0x4b8   : > { %p4885_p5 = pnand %p4889_p2, %p6662_p1 }
 0x4ba   : > { %5254 = dma.done.wait (!%p4885_p5), %s3737_s2, 2048  }
 0x4bb   : > { %5256 = vsyncadd (!%p4885_p5), %s3737_s2, 4294965248  ;;  %s31_s16 = sadd.s32 1, %s5311_s16   ;;  %s6664_s24 = sld [smem:[#allocation14_spill]] }
 0x4bc   : > { %p6502_p8 = scmp.ge.s32.totalorder %s31_s16, 6   ;;  %s6665_s8 = sld [smem:[#allocation24_spill]] }
 0x4bd   : > { %s6666_s7 = sld [smem:[#allocation15_spill]]  ;;  %s6667_s29 = sld [smem:[#allocation25_spill]] }
 0x4be   : > { %s6668_s30 = sld [smem:[#allocation18_spill]]  ;;  %s6669_s13 = sld [smem:[#allocation19_spill]] }
 0x4bf   : > { %s6670_s14 = sld [smem:[#allocation20_spill]]  ;;  %s6671_s15 = sld [smem:[#allocation21_spill]] }
 0x4c0   : > { %s6672_s21 = smov %s5263_s22  ;;  %s6673_s22 = smov %s5267_s23 }
 0x4c1   : > { %s6674_s23 = smov %s5678_s1  ;;  %s6675_s25 = smov %s5279_s26 }
 0x4c2   : > { %s6676_s26 = smov %s6665_s8  ;;  %s6677_s27 = smov %s5287_s28 }
 0x4c3   : > { %s6678_s28 = smov %s6666_s7  ;;  %30 = sbr.rel (!%p6502_p8) target bundleno = 26 (0x1a), region = 149 }
 0x4ca   :  { %3742 = vsyncpa [#allocation4], 1 }
 0x4cb   :  { %3744 = vsyncpa [#allocation4 + $0x1], 1 }
 0x4cc   :  { %3745 = vsyncpa [#allocation7], 1 }
 0x4cd   :  { %3747 = vsyncpa [#allocation7 + $0x1], 1 }
 0x4ce   :  { %3748 = vsyncpa [#allocation5], 1 }
 0x4cf   :  { %3750 = vsyncpa [#allocation5 + $0x1], 1 }

</bundles_post_ra>
